<compile_context>
chip_gen: v7x
topology: tpu7x:2x2x1
jax: 0.10.0
libtpu: 0.0.40
codegen_flags: <defaults>
</compile_context>

<pallas_src>
import functools

import jax
import jax.numpy as jnp
from jax.experimental import pallas as pl
from jax.experimental.pallas import tpu as pltpu


def _round_up(x: int, m: int) -> int:
    return ((x + m - 1) // m) * m


def _conv_bn_relu_kernel(x_ref, w_ref, shift_ref, o_ref, *scratch, kh, kw,
                         stride, dilation, oh, ow_p, need_relu, n_c_steps,
                         use_acc_ref):
    """Fused conv (as KH*KW shifted dot-accumulates) + BN shift + ReLU.

    Grid = (batch, OC tiles, C tiles); C (reduction) is the innermost axis.

    x_ref:     (1, Hp, Wp, TC)      padded NHWC input slab (one channel tile)
    w_ref:     (KH, KW, TC, TOC)    conv weights, BN scale pre-folded
    shift_ref: (1, TOC)             folded BN shift (f32)
    o_ref:     (1, OH, OWp, TOC)    output tile
    scratch:   optional (OH*OWp, TOC) f32 accumulator (only when use_acc_ref)
    """
    tc = x_ref.shape[-1]
    toc = o_ref.shape[-1]
    nm = oh * ow_p

    def tap(i, j):
        h0 = i * dilation
        w0 = j * dilation
        if stride == 1:
            xs = x_ref[0, h0:h0 + oh, w0:w0 + ow_p, :]
        else:
            xs = x_ref[0, pl.ds(h0, oh, stride), pl.ds(w0, ow_p, stride), :]
        return jnp.dot(xs.reshape(nm, tc), w_ref[i, j],
                       preferred_element_type=jnp.float32)

    taps = [(i, j) for i in range(kh) for j in range(kw)]

    def finish(y):
        y = y + shift_ref[...]          # BN scale already folded into weights
        if need_relu:
            y = jnp.maximum(y, 0.0)
        return y.reshape(o_ref.shape).astype(o_ref.dtype)

    if not use_acc_ref:
        # Small tile, single reduction step: accumulate in registers, one store.
        y = tap(*taps[0])
        for (i, j) in taps[1:]:
            y = y + tap(i, j)
        o_ref[...] = finish(y)
        return

    acc_ref = scratch[0]
    c = pl.program_id(2)

    # First tap of this C tile: initialize or accumulate (no zero-fill pass).
    d0 = tap(*taps[0])
    if n_c_steps == 1:
        acc_ref[...] = d0
    else:
        @pl.when(c == 0)
        def _():
            acc_ref[...] = d0

        @pl.when(c != 0)
        def _():
            acc_ref[...] += d0

    # Middle taps accumulate into VMEM scratch.
    for (i, j) in taps[1:-1]:
        acc_ref[...] += tap(i, j)

    d_last = tap(*taps[-1]) if len(taps) > 1 else None

    def epilogue():
        y = acc_ref[...]
        if d_last is not None:
            y = y + d_last              # fuse last tap; skip its acc store+load
        o_ref[...] = finish(y)

    if n_c_steps == 1:
        epilogue()
    else:
        if d_last is not None:
            @pl.when(c != n_c_steps - 1)
            def _():
                acc_ref[...] += d_last

        @pl.when(c == n_c_steps - 1)
        def _():
            epilogue()


def basic_conv2d(x, weight, gamma, beta, running_mean, running_var, *,
                 stride=1, padding=0, dilation=1, need_relu=True, eps=1e-5,
                 compute_dtype=jnp.bfloat16, out_dtype=jnp.float32,
                 nhwc_out=False):
    """x: (N, C, H, W); weight: (OC, C, KH, KW).

    Returns (N, OC, OH, OW) in out_dtype (or (N, OH, OW, OC) if nhwc_out=True).
    compute_dtype=bf16 (default) halves DMA bytes and uses the native bf16 MXU on
    v5e/v6e/v7x; accumulation stays f32.  Pass compute_dtype=jnp.float32 for
    bit-accuracy.
    """
    n, c_in, h, w = x.shape
    oc, _, kh, kw = weight.shape

    compute_dtype = jnp.dtype(compute_dtype)
    out_dtype = jnp.dtype(out_dtype)
    itemsize = compute_dtype.itemsize
    out_itemsize = out_dtype.itemsize

    oh = (h + 2 * padding - dilation * (kh - 1) - 1) // stride + 1
    ow = (w + 2 * padding - dilation * (kw - 1) - 1) // stride + 1

    # ---- BatchNorm folding (inference mode), all in f32 ----
    inv_std = jax.lax.rsqrt(running_var.astype(jnp.float32) + eps)
    bn_scale = gamma.astype(jnp.float32) * inv_std                        # (OC,)
    bn_shift = (beta.astype(jnp.float32)
                - running_mean.astype(jnp.float32) * bn_scale)            # (OC,)

    # Weights -> (KH, KW, C, OC) channels-last, BN scale folded into OC (exact).
    w_t = jnp.transpose(weight.astype(jnp.float32), (2, 3, 1, 0)) * bn_scale

    # ---- OC tiling: lane-dense (multiple of 128), balanced, <= 512 wide ----
    oc_pad_min = _round_up(oc, 128)
    n_j = max(1, -(-oc_pad_min // 512))
    if n * n_j < 2 and oc_pad_min >= 256:
        n_j = 2                        # keep >= 2 parallel tiles for v7x's 2 TCs
    toc = _round_up(-(-oc_pad_min // n_j), 128)
    oc_pad = toc * n_j

    # ---- Spatial sizing (output width aligned for clean sublane layout) ----
    w_align = 16 if itemsize == 2 else 8     # bf16 packs (16,128) sublane tiles
    ow_p = _round_up(ow, w_align)
    hp_req = dilation * (kh - 1) + (oh - 1) * stride + 1
    wp_req = dilation * (kw - 1) + (ow_p - 1) * stride + 1
    pad_b = max(0, hp_req - h - padding)
    pad_r = max(0, wp_req - w - padding)
    hp = h + padding + pad_b
    wp = w + padding + pad_r
    nm = oh * ow_p

    # ---- Channel (reduction) tiling: only when the slab / K gets large ----
    x_block_budget = 4 * 1024 * 1024     # per-buffer; conservative for v5e VMEM
    n_c = max(1,
              -(-(hp * wp * c_in * itemsize) // x_block_budget),
              -(-c_in // 512))
    n_c = min(n_c, c_in // 128) if c_in >= 128 else 1
    n_c = max(n_c, 1)
    if n_c > 1:
        tc = _round_up(-(-c_in // n_c), 128)     # 128-aligned reduction tile
    else:
        tc = _round_up(c_in, 8)                  # sublane-align the contraction
    c_pad = tc * n_c

    # ---- Host-side prep: ONE pass over x (NCHW->NHWC + pad); no im2col ----
    x_nhwc = jnp.transpose(x, (0, 2, 3, 1)).astype(compute_dtype)
    x_nhwc = jnp.pad(x_nhwc, ((0, 0), (padding, pad_b), (padding, pad_r),
                              (0, c_pad - c_in)))
    w_t = jnp.pad(w_t, ((0, 0), (0, 0), (0, c_pad - c_in), (0, oc_pad - oc)))
    w_t = w_t.astype(compute_dtype)
    shift = jnp.pad(bn_shift, (0, oc_pad - oc)).reshape(1, oc_pad)   # f32

    grid = (n, oc_pad // toc, n_c)
    use_acc_ref = (n_c > 1) or (nm * toc * 4 > 512 * 1024)

    cost = pl.CostEstimate(
        flops=2 * n * oh * ow * kh * kw * c_in * oc,          # unpadded dims
        transcendentals=0,
        bytes_accessed=(n * hp * wp * c_pad * itemsize * grid[1]   # x per OC tile
                        + n * kh * kw * c_pad * oc_pad * itemsize  # w per batch
                        + n * oh * ow_p * oc_pad * out_itemsize),
    )

    vmem_est = (2 * hp * wp * tc * itemsize            # double-buffered input slab
                + 2 * kh * kw * tc * toc * itemsize    # double-buffered weights
                + 2 * nm * toc * out_itemsize          # double-buffered output
                + (nm * toc * 4 if use_acc_ref else 0)
                + 2 * oc_pad * 4)
    vmem_limit = None
    if vmem_est > 24 * 1024 * 1024:
        vmem_limit = min(48 * 1024 * 1024, int(vmem_est * 1.5) + 4 * 1024 * 1024)

    kernel = functools.partial(
        _conv_bn_relu_kernel, kh=kh, kw=kw, stride=stride, dilation=dilation,
        oh=oh, ow_p=ow_p, need_relu=need_relu, n_c_steps=n_c,
        use_acc_ref=use_acc_ref)

    scratch_shapes = [pltpu.VMEM((nm, toc), jnp.float32)] if use_acc_ref else []

    out = pl.pallas_call(
        kernel,
        out_shape=jax.ShapeDtypeStruct((n, oh, ow_p, oc_pad), out_dtype),
        grid_spec=pltpu.PrefetchScalarGridSpec(
            num_scalar_prefetch=0,
            grid=grid,
            in_specs=[
                pl.BlockSpec((1, hp, wp, tc), lambda b, j, cc: (b, 0, 0, cc)),
                pl.BlockSpec((kh, kw, tc, toc), lambda b, j, cc: (0, 0, cc, j)),
                pl.BlockSpec((1, toc), lambda b, j, cc: (0, j)),
            ],
            out_specs=pl.BlockSpec((1, oh, ow_p, toc),
                                   lambda b, j, cc: (b, 0, 0, j)),
            scratch_shapes=scratch_shapes,
        ),
        compiler_params=pltpu.CompilerParams(
            dimension_semantics=("parallel", "parallel", "arbitrary"),
            vmem_limit_bytes=vmem_limit),
        cost_estimate=cost,
    )(x_nhwc, w_t, shift)

    out = out[:, :, :ow, :oc]
    if nhwc_out:
        return out
    # NOTE: this transpose costs a full extra HBM read+write of the activation;
    # prefer nhwc_out=True if the consumer accepts channels-last.
    return jnp.transpose(out, (0, 3, 1, 2))   # NCHW, matching the PyTorch module


def _reference(x, weight, gamma, beta, running_mean, running_var, *,
               stride, padding, dilation, need_relu, eps=1e-5):
    y = jax.lax.conv_general_dilated(
        x, weight,
        window_strides=(stride, stride),
        padding=((padding, padding), (padding, padding)),
        rhs_dilation=(dilation, dilation),
        dimension_numbers=("NCHW", "OIHW", "NCHW"),
        precision=jax.lax.Precision.HIGHEST)
    inv_std = jax.lax.rsqrt(running_var + eps)
    scale = (gamma * inv_std)[None, :, None, None]
    shift = (beta - running_mean * gamma * inv_std)[None, :, None, None]
    y = y * scale + shift
    if need_relu:
        y = jnp.maximum(y, 0.0)
    return y


if __name__ == "__main__":
    key = jax.random.PRNGKey(0)
    k_x, k_w, k_g, k_b, k_m, k_v = jax.random.split(key, 6)

    N, C, H, W = 2, 4, 16, 16
    OC, KH, KW = 8, 3, 3
    stride, padding, dilation = 1, 1, 1

    x = jax.random.normal(k_x, (N, C, H, W), dtype=jnp.float32)
    weight = jax.random.normal(k_w, (OC, C, KH, KW), dtype=jnp.float32) * 0.1
    gamma = 1.0 + 0.1 * jax.random.normal(k_g, (OC,), dtype=jnp.float32)
    beta = 0.1 * jax.random.normal(k_b, (OC,), dtype=jnp.float32)
    running_mean = 0.1 * jax.random.normal(k_m, (OC,), dtype=jnp.float32)
    running_var = 1.0 + 0.1 * jax.random.uniform(k_v, (OC,), dtype=jnp.float32)

    ref = _reference(x, weight, gamma, beta, running_mean, running_var,
                     stride=stride, padding=padding, dilation=dilation,
                     need_relu=True)

    # f32 compute path (bit-accuracy check vs reference).
    out_f32 = basic_conv2d(x, weight, gamma, beta, running_mean, running_var,
                           stride=stride, padding=padding, dilation=dilation,
                           need_relu=True, compute_dtype=jnp.float32)
    out_f32 = jax.block_until_ready(out_f32)
    assert out_f32.shape == (N, OC, H, W), out_f32.shape
    assert jnp.allclose(out_f32, ref, atol=1e-3, rtol=1e-3), \
        float(jnp.max(jnp.abs(out_f32 - ref)))

    # Default bf16 compute path (recommended on v5e/v6e/v7x); f32 accumulation.
    out_bf16 = basic_conv2d(x, weight, gamma, beta, running_mean, running_var,
                            stride=stride, padding=padding, dilation=dilation,
                            need_relu=True)
    out_bf16 = jax.block_until_ready(out_bf16)
    assert out_bf16.shape == (N, OC, H, W), out_bf16.shape
    assert jnp.allclose(out_bf16, ref, atol=5e-2, rtol=5e-2), \
        float(jnp.max(jnp.abs(out_bf16 - ref)))

    # 1x1 conv, no ReLU, channels-last output (single-tap path, no NCHW transpose).
    w1 = jax.random.normal(k_w, (OC, C, 1, 1), dtype=jnp.float32) * 0.1
    ref1 = _reference(x, w1, gamma, beta, running_mean, running_var,
                      stride=1, padding=0, dilation=1, need_relu=False)
    out1 = basic_conv2d(x, w1, gamma, beta, running_mean, running_var,
                        stride=1, padding=0, dilation=1, need_relu=False,
                        compute_dtype=jnp.float32, nhwc_out=True)
    out1 = jax.block_until_ready(out1)
    assert out1.shape == (N, H, W, OC), out1.shape
    assert jnp.allclose(jnp.transpose(out1, (0, 3, 1, 2)), ref1,
                        atol=1e-3, rtol=1e-3), \
        float(jnp.max(jnp.abs(jnp.transpose(out1, (0, 3, 1, 2)) - ref1)))

    print("KERNEL_OK")
</pallas_src>

<mosaic_0001>
module attributes {stable_mosaic.version = 11 : i64} {
  func.func @_conv_bn_relu_kernel(%arg0: i32, %arg1: i32, %arg2: i32, %arg3: memref<1x18x18x8xf32, #tpu.memory_space<vmem>>, %arg4: memref<3x3x8x128xf32, #tpu.memory_space<vmem>>, %arg5: memref<1x128xf32, #tpu.memory_space<vmem>>, %arg6: memref<1x16x16x128xf32, #tpu.memory_space<vmem>>) attributes {dimension_semantics = [#tpu.dimension_semantics<parallel>, #tpu.dimension_semantics<parallel>, #tpu.dimension_semantics<arbitrary>], iteration_bounds = array<i64: 2, 1, 1>, scalar_prefetch = 0 : i64, scratch_operands = 0 : i64, tpu.core_type = #tpu.core_type<tc>, window_params = [{transform_indices = @transform_0, window_bounds = array<i64: 1, 18, 18, 8>}, {transform_indices = @transform_1, window_bounds = array<i64: 3, 3, 8, 128>}, {transform_indices = @transform_2, window_bounds = array<i64: 1, 128>}, {transform_indices = @transform_3, window_bounds = array<i64: 1, 16, 16, 128>}]} {
    %c0 = arith.constant 0 : index
    %c0_0 = arith.constant 0 : index
    %c0_1 = arith.constant 0 : index
    %c0_2 = arith.constant 0 : index
    %0 = vector.load %arg3[%c0, %c0_0, %c0_1, %c0_2] : memref<1x18x18x8xf32, #tpu.memory_space<vmem>>, vector<1x16x16x8xf32>
    %1 = vector.shape_cast %0 : vector<1x16x16x8xf32> to vector<16x16x8xf32>
    %2 = vector.shape_cast %1 : vector<16x16x8xf32> to vector<256x8xf32>
    %c0_3 = arith.constant 0 : index
    %c0_4 = arith.constant 0 : index
    %c0_5 = arith.constant 0 : index
    %c0_6 = arith.constant 0 : index
    %3 = vector.load %arg4[%c0_3, %c0_4, %c0_5, %c0_6] : memref<3x3x8x128xf32, #tpu.memory_space<vmem>>, vector<1x1x8x128xf32>
    %4 = vector.shape_cast %3 : vector<1x1x8x128xf32> to vector<8x128xf32>
    %cst = arith.constant dense<0.000000e+00> : vector<256x128xf32>
    %5 = tpu.matmul %2, %4, %cst {dimension_numbers = #tpu.dot_dimension_numbers<[1], [0], [0], [1], [0, 0, 1, 1], [], []>} : vector<256x8xf32>, vector<8x128xf32>, vector<256x128xf32> -> vector<256x128xf32>
    %c0_7 = arith.constant 0 : index
    %c0_8 = arith.constant 0 : index
    %c1 = arith.constant 1 : index
    %c0_9 = arith.constant 0 : index
    %6 = vector.load %arg3[%c0_7, %c0_8, %c1, %c0_9] : memref<1x18x18x8xf32, #tpu.memory_space<vmem>>, vector<1x16x16x8xf32>
    %7 = vector.shape_cast %6 : vector<1x16x16x8xf32> to vector<16x16x8xf32>
    %8 = vector.shape_cast %7 : vector<16x16x8xf32> to vector<256x8xf32>
    %c0_10 = arith.constant 0 : index
    %c1_11 = arith.constant 1 : index
    %c0_12 = arith.constant 0 : index
    %c0_13 = arith.constant 0 : index
    %9 = vector.load %arg4[%c0_10, %c1_11, %c0_12, %c0_13] : memref<3x3x8x128xf32, #tpu.memory_space<vmem>>, vector<1x1x8x128xf32>
    %10 = vector.shape_cast %9 : vector<1x1x8x128xf32> to vector<8x128xf32>
    %cst_14 = arith.constant dense<0.000000e+00> : vector<256x128xf32>
    %11 = tpu.matmul %8, %10, %cst_14 {dimension_numbers = #tpu.dot_dimension_numbers<[1], [0], [0], [1], [0, 0, 1, 1], [], []>} : vector<256x8xf32>, vector<8x128xf32>, vector<256x128xf32> -> vector<256x128xf32>
    %12 = arith.addf %5, %11 : vector<256x128xf32>
    %c0_15 = arith.constant 0 : index
    %c0_16 = arith.constant 0 : index
    %c2 = arith.constant 2 : index
    %c0_17 = arith.constant 0 : index
    %13 = vector.load %arg3[%c0_15, %c0_16, %c2, %c0_17] : memref<1x18x18x8xf32, #tpu.memory_space<vmem>>, vector<1x16x16x8xf32>
    %14 = vector.shape_cast %13 : vector<1x16x16x8xf32> to vector<16x16x8xf32>
    %15 = vector.shape_cast %14 : vector<16x16x8xf32> to vector<256x8xf32>
    %c0_18 = arith.constant 0 : index
    %c2_19 = arith.constant 2 : index
    %c0_20 = arith.constant 0 : index
    %c0_21 = arith.constant 0 : index
    %16 = vector.load %arg4[%c0_18, %c2_19, %c0_20, %c0_21] : memref<3x3x8x128xf32, #tpu.memory_space<vmem>>, vector<1x1x8x128xf32>
    %17 = vector.shape_cast %16 : vector<1x1x8x128xf32> to vector<8x128xf32>
    %cst_22 = arith.constant dense<0.000000e+00> : vector<256x128xf32>
    %18 = tpu.matmul %15, %17, %cst_22 {dimension_numbers = #tpu.dot_dimension_numbers<[1], [0], [0], [1], [0, 0, 1, 1], [], []>} : vector<256x8xf32>, vector<8x128xf32>, vector<256x128xf32> -> vector<256x128xf32>
    %19 = arith.addf %12, %18 : vector<256x128xf32>
    %c0_23 = arith.constant 0 : index
    %c1_24 = arith.constant 1 : index
    %c0_25 = arith.constant 0 : index
    %c0_26 = arith.constant 0 : index
    %20 = vector.load %arg3[%c0_23, %c1_24, %c0_25, %c0_26] : memref<1x18x18x8xf32, #tpu.memory_space<vmem>>, vector<1x16x16x8xf32>
    %21 = vector.shape_cast %20 : vector<1x16x16x8xf32> to vector<16x16x8xf32>
    %22 = vector.shape_cast %21 : vector<16x16x8xf32> to vector<256x8xf32>
    %c1_27 = arith.constant 1 : index
    %c0_28 = arith.constant 0 : index
    %c0_29 = arith.constant 0 : index
    %c0_30 = arith.constant 0 : index
    %23 = vector.load %arg4[%c1_27, %c0_28, %c0_29, %c0_30] : memref<3x3x8x128xf32, #tpu.memory_space<vmem>>, vector<1x1x8x128xf32>
    %24 = vector.shape_cast %23 : vector<1x1x8x128xf32> to vector<8x128xf32>
    %cst_31 = arith.constant dense<0.000000e+00> : vector<256x128xf32>
    %25 = tpu.matmul %22, %24, %cst_31 {dimension_numbers = #tpu.dot_dimension_numbers<[1], [0], [0], [1], [0, 0, 1, 1], [], []>} : vector<256x8xf32>, vector<8x128xf32>, vector<256x128xf32> -> vector<256x128xf32>
    %26 = arith.addf %19, %25 : vector<256x128xf32>
    %c0_32 = arith.constant 0 : index
    %c1_33 = arith.constant 1 : index
    %c1_34 = arith.constant 1 : index
    %c0_35 = arith.constant 0 : index
    %27 = vector.load %arg3[%c0_32, %c1_33, %c1_34, %c0_35] : memref<1x18x18x8xf32, #tpu.memory_space<vmem>>, vector<1x16x16x8xf32>
    %28 = vector.shape_cast %27 : vector<1x16x16x8xf32> to vector<16x16x8xf32>
    %29 = vector.shape_cast %28 : vector<16x16x8xf32> to vector<256x8xf32>
    %c1_36 = arith.constant 1 : index
    %c1_37 = arith.constant 1 : index
    %c0_38 = arith.constant 0 : index
    %c0_39 = arith.constant 0 : index
    %30 = vector.load %arg4[%c1_36, %c1_37, %c0_38, %c0_39] : memref<3x3x8x128xf32, #tpu.memory_space<vmem>>, vector<1x1x8x128xf32>
    %31 = vector.shape_cast %30 : vector<1x1x8x128xf32> to vector<8x128xf32>
    %cst_40 = arith.constant dense<0.000000e+00> : vector<256x128xf32>
    %32 = tpu.matmul %29, %31, %cst_40 {dimension_numbers = #tpu.dot_dimension_numbers<[1], [0], [0], [1], [0, 0, 1, 1], [], []>} : vector<256x8xf32>, vector<8x128xf32>, vector<256x128xf32> -> vector<256x128xf32>
    %33 = arith.addf %26, %32 : vector<256x128xf32>
    %c0_41 = arith.constant 0 : index
    %c1_42 = arith.constant 1 : index
    %c2_43 = arith.constant 2 : index
    %c0_44 = arith.constant 0 : index
    %34 = vector.load %arg3[%c0_41, %c1_42, %c2_43, %c0_44] : memref<1x18x18x8xf32, #tpu.memory_space<vmem>>, vector<1x16x16x8xf32>
    %35 = vector.shape_cast %34 : vector<1x16x16x8xf32> to vector<16x16x8xf32>
    %36 = vector.shape_cast %35 : vector<16x16x8xf32> to vector<256x8xf32>
    %c1_45 = arith.constant 1 : index
    %c2_46 = arith.constant 2 : index
    %c0_47 = arith.constant 0 : index
    %c0_48 = arith.constant 0 : index
    %37 = vector.load %arg4[%c1_45, %c2_46, %c0_47, %c0_48] : memref<3x3x8x128xf32, #tpu.memory_space<vmem>>, vector<1x1x8x128xf32>
    %38 = vector.shape_cast %37 : vector<1x1x8x128xf32> to vector<8x128xf32>
    %cst_49 = arith.constant dense<0.000000e+00> : vector<256x128xf32>
    %39 = tpu.matmul %36, %38, %cst_49 {dimension_numbers = #tpu.dot_dimension_numbers<[1], [0], [0], [1], [0, 0, 1, 1], [], []>} : vector<256x8xf32>, vector<8x128xf32>, vector<256x128xf32> -> vector<256x128xf32>
    %40 = arith.addf %33, %39 : vector<256x128xf32>
    %c0_50 = arith.constant 0 : index
    %c2_51 = arith.constant 2 : index
    %c0_52 = arith.constant 0 : index
    %c0_53 = arith.constant 0 : index
    %41 = vector.load %arg3[%c0_50, %c2_51, %c0_52, %c0_53] : memref<1x18x18x8xf32, #tpu.memory_space<vmem>>, vector<1x16x16x8xf32>
    %42 = vector.shape_cast %41 : vector<1x16x16x8xf32> to vector<16x16x8xf32>
    %43 = vector.shape_cast %42 : vector<16x16x8xf32> to vector<256x8xf32>
    %c2_54 = arith.constant 2 : index
    %c0_55 = arith.constant 0 : index
    %c0_56 = arith.constant 0 : index
    %c0_57 = arith.constant 0 : index
    %44 = vector.load %arg4[%c2_54, %c0_55, %c0_56, %c0_57] : memref<3x3x8x128xf32, #tpu.memory_space<vmem>>, vector<1x1x8x128xf32>
    %45 = vector.shape_cast %44 : vector<1x1x8x128xf32> to vector<8x128xf32>
    %cst_58 = arith.constant dense<0.000000e+00> : vector<256x128xf32>
    %46 = tpu.matmul %43, %45, %cst_58 {dimension_numbers = #tpu.dot_dimension_numbers<[1], [0], [0], [1], [0, 0, 1, 1], [], []>} : vector<256x8xf32>, vector<8x128xf32>, vector<256x128xf32> -> vector<256x128xf32>
    %47 = arith.addf %40, %46 : vector<256x128xf32>
    %c0_59 = arith.constant 0 : index
    %c2_60 = arith.constant 2 : index
    %c1_61 = arith.constant 1 : index
    %c0_62 = arith.constant 0 : index
    %48 = vector.load %arg3[%c0_59, %c2_60, %c1_61, %c0_62] : memref<1x18x18x8xf32, #tpu.memory_space<vmem>>, vector<1x16x16x8xf32>
    %49 = vector.shape_cast %48 : vector<1x16x16x8xf32> to vector<16x16x8xf32>
    %50 = vector.shape_cast %49 : vector<16x16x8xf32> to vector<256x8xf32>
    %c2_63 = arith.constant 2 : index
    %c1_64 = arith.constant 1 : index
    %c0_65 = arith.constant 0 : index
    %c0_66 = arith.constant 0 : index
    %51 = vector.load %arg4[%c2_63, %c1_64, %c0_65, %c0_66] : memref<3x3x8x128xf32, #tpu.memory_space<vmem>>, vector<1x1x8x128xf32>
    %52 = vector.shape_cast %51 : vector<1x1x8x128xf32> to vector<8x128xf32>
    %cst_67 = arith.constant dense<0.000000e+00> : vector<256x128xf32>
    %53 = tpu.matmul %50, %52, %cst_67 {dimension_numbers = #tpu.dot_dimension_numbers<[1], [0], [0], [1], [0, 0, 1, 1], [], []>} : vector<256x8xf32>, vector<8x128xf32>, vector<256x128xf32> -> vector<256x128xf32>
    %54 = arith.addf %47, %53 : vector<256x128xf32>
    %c0_68 = arith.constant 0 : index
    %c2_69 = arith.constant 2 : index
    %c2_70 = arith.constant 2 : index
    %c0_71 = arith.constant 0 : index
    %55 = vector.load %arg3[%c0_68, %c2_69, %c2_70, %c0_71] : memref<1x18x18x8xf32, #tpu.memory_space<vmem>>, vector<1x16x16x8xf32>
    %56 = vector.shape_cast %55 : vector<1x16x16x8xf32> to vector<16x16x8xf32>
    %57 = vector.shape_cast %56 : vector<16x16x8xf32> to vector<256x8xf32>
    %c2_72 = arith.constant 2 : index
    %c2_73 = arith.constant 2 : index
    %c0_74 = arith.constant 0 : index
    %c0_75 = arith.constant 0 : index
    %58 = vector.load %arg4[%c2_72, %c2_73, %c0_74, %c0_75] : memref<3x3x8x128xf32, #tpu.memory_space<vmem>>, vector<1x1x8x128xf32>
    %59 = vector.shape_cast %58 : vector<1x1x8x128xf32> to vector<8x128xf32>
    %cst_76 = arith.constant dense<0.000000e+00> : vector<256x128xf32>
    %60 = tpu.matmul %57, %59, %cst_76 {dimension_numbers = #tpu.dot_dimension_numbers<[1], [0], [0], [1], [0, 0, 1, 1], [], []>} : vector<256x8xf32>, vector<8x128xf32>, vector<256x128xf32> -> vector<256x128xf32>
    %61 = arith.addf %54, %60 : vector<256x128xf32>
    %c0_77 = arith.constant 0 : index
    %c0_78 = arith.constant 0 : index
    %62 = vector.load %arg5[%c0_77, %c0_78] : memref<1x128xf32, #tpu.memory_space<vmem>>, vector<1x128xf32>
    %63 = vector.broadcast %62 : vector<1x128xf32> to vector<256x128xf32>
    %64 = arith.addf %61, %63 : vector<256x128xf32>
    %cst_79 = arith.constant 0.000000e+00 : f32
    %65 = vector.broadcast %cst_79 : f32 to vector<256x128xf32>
    %66 = arith.maximumf %64, %65 : vector<256x128xf32>
    %67 = vector.shape_cast %66 : vector<256x128xf32> to vector<1x16x16x128xf32>
    %c0_80 = arith.constant 0 : index
    %c0_81 = arith.constant 0 : index
    %c0_82 = arith.constant 0 : index
    %c0_83 = arith.constant 0 : index
    %68 = vector.load %arg6[%c0_80, %c0_81, %c0_82, %c0_83] : memref<1x16x16x128xf32, #tpu.memory_space<vmem>>, vector<1x16x16x128xf32>
    tpu.vector_store %arg6[%c0_80, %c0_81, %c0_82, %c0_83], %67 {strides = array<i32>} : memref<1x16x16x128xf32, #tpu.memory_space<vmem>>, vector<1x16x16x128xf32>,
    return
  }
  func.func @transform_0(%arg0: i32, %arg1: i32, %arg2: i32) -> (i32, i32, i32, i32) {
    %c0_i32 = arith.constant 0 : i32
    %c0_i32_0 = arith.constant 0 : i32
    %c0_i32_1 = arith.constant 0 : i32
    return %arg0, %c0_i32, %c0_i32_0, %arg2 : i32, i32, i32, i32
  }
  func.func @transform_1(%arg0: i32, %arg1: i32, %arg2: i32) -> (i32, i32, i32, i32) {
    %c0_i32 = arith.constant 0 : i32
    %c0_i32_0 = arith.constant 0 : i32
    %c0_i32_1 = arith.constant 0 : i32
    return %c0_i32, %c0_i32_0, %arg2, %arg1 : i32, i32, i32, i32
  }
  func.func @transform_2(%arg0: i32, %arg1: i32, %arg2: i32) -> (i32, i32) {
    %c0_i32 = arith.constant 0 : i32
    %c0_i32_0 = arith.constant 0 : i32
    return %c0_i32, %arg1 : i32, i32
  }
  func.func @transform_3(%arg0: i32, %arg1: i32, %arg2: i32) -> (i32, i32, i32, i32) {
    %c0_i32 = arith.constant 0 : i32
    %c0_i32_0 = arith.constant 0 : i32
    %c0_i32_1 = arith.constant 0 : i32
    return %arg0, %c0_i32, %c0_i32_0, %arg1 : i32, i32, i32, i32
  }
}

</mosaic_0001>

<bundles_post_ra>
// kernel: tpu_custom_call.1
= control target key start
LH: loop header
LB: loop body
LE: loop exit
PB: predicated region body
PF: predicated region fallthrough
CT: control target
= control target key end

     0   :  { %8 = vsyncpa [#allocation3], 0  ;;  %s6673_s0 = inlined_call_operand.vmem [shape: f32[2,18,18,8], index: 0, kind: input, shape index: {}]   ;;  %s6674_s1 = inlined_call_operand.vmem [shape: f32[3,3,8,128], index: 1, kind: input, shape index: {}]   ;;  %s6675_s2 = inlined_call_operand.vmem [shape: f32[1,128], index: 2, kind: input, shape index: {}]   ;;  %s6676_s3 = inlined_call_operand.hbm [shape: f32[2,16,16,128], index: 3, kind: output, shape index: {}]  }
   0x1   :  { %10 = vsyncpa [#allocation3 + $0x1], 0  ;;  %s5563_s12 = smov 0   ;;  %s5565_s13 = smov 0  }
   0x2   :  { %s5567_s14 = smov 0   ;;  %s5569_s15 = smov 0  }
   0x3   :  { %s5571_s16 = smov 0   ;;  %s5573_s17 = smov 0  }
   0x4 LB: > { %s3893_s18 = sadd.s32 4294967295, %s5538_s17   ;;  %s3894_s19 = sadd.s32 4294967294, %s5538_s17   ;;  %s5538_s17 = sphi %s5573_s17, %s16_s17   ;;  %s5534_s16 = sphi %s5571_s16, %s6792_s16   ;;  %s5530_s15 = sphi %s5569_s15, %s6791_s15   ;;  %s5526_s14 = sphi %s5567_s14, %s6790_s14   ;;  %s5522_s13 = sphi %s5565_s13, %s6789_s13   ;;  %s5518_s12 = sphi %s5563_s12, %s6788_s12  }
   0x5   : > { %s35_s20 = sadd.s32 1, %s5534_s16  ;;  %s126_s21 = sadd.s32 1, %s5526_s14 }
   0x6   : > { %p37_p0 = scmp.ge.s32.totalorder %s35_s20, 2  ;;  %p136_p1 = scmp.ne.s32.totalorder %s5526_s14, %s5522_s13 }
   0x7   : > { %p137_p2 = scmp.eq.s32.totalorder %s3893_s18, 1  ;;  %p142_p3 = scmp.ne.s32.totalorder %s5522_s13, %s5518_s12 }
   0x8   : > { %s6794_s20 = smov (%p37_p0, %s35_s20), 0  ;;  %p143_p5 = scmp.eq.s32.totalorder %s3894_s19, 1 }
   0x9   : > { %p5603_p4 = por %p137_p2, %p136_p1  ;;  %s121_s23 = ssub.s32 %s5534_s16, %s6794_s20 }
   0xa   : > { %p3899_p6 = scmp.ge.s32.totalorder %s5538_s17, 1  ;;  %p124_p7 = scmp.eq.s32.totalorder %s121_s23, 0 }
   0xb   : > { %p5610_p8 = por %p143_p5, %p142_p3  ;;  %p188_p9 = scmp.lt.s32.totalorder %s5538_s17, 3 }
   0xc   : > { %s5616_s25 = scalar_select %p124_p7, %s5526_s14, %s126_s21  }
   0xd   : > { %p189_p10 = pnand %p3899_p6, %p188_p9 }
   0xf   : > { %192 = sbr.rel (%p189_p10) target bundleno = 549 (0x225), region = 32 }
  0x16   : > { %v3902_v0 = vld [vmem:[%s6674_s1 + $0x8] sm:$0xff]  ;;  %v5624_v1 = vld [vmem:[%s6674_s1 + $0x20] sm:$0xff]  ;;  %p225_p11 = scmp.lt.s32.totalorder %s5530_s15, 1  ;;  %vm310_vm0 = vcmask 64512   ;;  %v4227_v9 = vld [vmem:[%s6674_s1 + $0x30] sm:$0xff]  ;;  %s222_s5 = sand.u32 1, %s5522_s13  }
  0x17   : > { %v275_v2 = vld [vmem:[%s6674_s1] sm:$0xff]  ;;  %4694 = vmatprep.subr.mxu1 %v3902_v0  ;;  %4894 = vmatprep.subr.mxu0 %v5624_v1  ;;  %v4162_v3 = vld [vmem:[%s6674_s1 + $0x28] sm:$0xff]  ;;  %v5658_v10 = vld [vmem:[%s6674_s1 + $0x10] sm:$0xff]  ;;  %s4396_s10 = sshll.u32 %s5530_s15, 12  ;;  %s5540_s26 = smov [#allocation2]  }
  0x18   : > { %4695 = vmatpush3.msra.mxu1 %v3902_v0  ;;  %4895 = vmatpush3.msra.mxu0 %v5624_v1  ;;  %s226_s7 = scalar_select %p225_p11, %s5530_s15, 1  ;;  %v5773_v28 = vld [vmem:[%s6674_s1 + $0x38] sm:$0xff] }
  0x19   : > { %4744 = vmatprep.subr.mxu1 %v275_v2  ;;  %4944 = vmatprep.subr.mxu0 %v4162_v3  ;;  %v5934_v61 = vld [vmem:[%s6674_s1 + $0x18] sm:$0xff]  ;;  %s6619_s21 = scalar_lea.hbm %s6676_s3, %s4396_s10  ;;  %s6627_s15 = scalar_lea.sflag [#allocation3], %s222_s5 }
  0x1a   : > { %s5402_s8 = smul.u32 432, %s226_s7  ;;  %s5464_s27 = sshll.u32 %s5540_s26, 4  ;;  %s5465_s27 = int_to_ptr.vmem [resolvable:$false] %s5464_s27 }
  0x1b   : > { %s5466_s28 = scalar_lea.vmem %s5465_s27, 8192 }
  0x1c   : > { %s5639_s11 = scalar_lea.vmem %s6673_s0, %s5402_s8  ;;  %s3900_s8 = sshll.u32 %s222_s5, 8 }
  0x1d   : > { %v276_v4 = vld [vmem:[%s5639_s11 + $0x1] sm:$0xff]  ;;  %v4065_v5 = vld [vmem:[%s5639_s11 + $0x19] sm:$0xff]  ;;  %v277_v6 = vld [vmem:[%s5639_s11 + $0x9] sm:$0xff]  ;;  %s6548_s9 = scalar_lea.vmem [#allocation2], %s3900_s8 }
  0x1e   : > { %4696 = vmatprep.mubr.msk.f32.mxu1 %vm310_vm0, %v276_v4  ;;  %4896 = vmatprep.mubr.msk.f32.mxu0 %vm310_vm0, %v4065_v5  ;;  %v4066_v7 = vld [vmem:[%s5639_s11 + $0x21] sm:$0xff]  ;;  %v5648_v8 = vld [vmem:[%s5639_s11 + $0x31] sm:$0xff]  ;;  %v5661_v11 = vld [vmem:[%s5639_s11 + $0x39] sm:$0xff] }
  0x1f   : > { %4697 = vmatmul.mubr.msk.f32.vlgmr.msra.gmra.mrb[0].mxu1 %vm310_vm0, %v277_v6  ;;  %4897 = vmatmul.mubr.msk.f32.vlgmr.msra.gmra.mrb[0].mxu0 %vm310_vm0, %v4066_v7  ;;  %v5667_v12 = vld [vmem:[%s5639_s11 + $0x49] sm:$0xff]  ;;  %v5678_v13 = vld [vmem:[%s5639_s11 + $0x51] sm:$0xff]  ;;  %v5681_v14 = vld [vmem:[%s5639_s11 + $0x61] sm:$0xff] }
  0x20   : > { %4745 = vmatpush3.msra.mxu1 %v275_v2  ;;  %4945 = vmatpush3.msra.mxu0 %v4162_v3  ;;  %v5692_v15 = vld [vmem:[%s5639_s11 + $0x69] sm:$0xff]  ;;  %v5695_v16 = vld [vmem:[%s5639_s11 + $0x79] sm:$0xff]  ;;  %v5706_v17 = vld [vmem:[%s5639_s11 + $0x81] sm:$0xff] }
  0x21   : > { %4699 = vmatprep.mubr.msk.f32.mxu1 %vm310_vm0, %v4065_v5  ;;  %4899 = vmatprep.mubr.msk.f32.mxu0 %vm310_vm0, %v5648_v8  ;;  %v5709_v18 = vld [vmem:[%s5639_s11 + $0x91] sm:$0xff]  ;;  %v5720_v19 = vld [vmem:[%s5639_s11 + $0x99] sm:$0xff]  ;;  %v5723_v20 = vld [vmem:[%s5639_s11 + $0xa9] sm:$0xff] }
  0x22   : > { %4994 = vmatprep.subr.mxu0 %v4227_v9  ;;  %4794 = vmatprep.subr.mxu1 %v5658_v10  ;;  %v5734_v21 = vld [vmem:[%s5639_s11 + $0xb1] sm:$0xff]  ;;  %v5737_v22 = vld [vmem:[%s5639_s11 + $0xc1] sm:$0xff]  ;;  %v5748_v23 = vld [vmem:[%s5639_s11 + $0xc9] sm:$0xff] }
  0x23   : > { %4700 = vmatmul.mubr.msk.f32.gmra.mrb[2].mxu1 %vm310_vm0, %v4066_v7  ;;  %4900 = vmatmul.mubr.msk.f32.gmra.mrb[2].mxu0 %vm310_vm0, %v5661_v11  ;;  %v5751_v24 = vld [vmem:[%s5639_s11 + $0x1a] sm:$0xff]  ;;  %v5762_v25 = vld [vmem:[%s5639_s11 + $0x22] sm:$0xff]  ;;  %v5768_v27 = vld [vmem:[%s5639_s11 + $0x32] sm:$0xff] }
  0x24   : > { %4702 = vmatprep.mubr.msk.f32.mxu1 %vm310_vm0, %v5648_v8  ;;  %4902 = vmatprep.mubr.msk.f32.mxu0 %vm310_vm0, %v5667_v12  ;;  %v5765_v26 = vld [vmem:[%s5639_s11 + $0xd9] sm:$0xff]  ;;  %v5782_v29 = vld [vmem:[%s5639_s11 + $0xe1] sm:$0xff]  ;;  %v5790_v31 = vld [vmem:[%s5639_s11 + $0xf1] sm:$0xff] }
  0x25   : > { %6724 = vst [vmem:[#allocation5_spill] sm:$0xff] %v5782_v29  ;;  %v5785_v30 = vld [vmem:[%s5639_s11 + $0x3a] sm:$0xff]  ;;  %6725 = vst [vmem:[#allocation6_spill] sm:$0xff] %v5790_v31  ;;  %v5793_v32 = vld [vmem:[%s5639_s11 + $0x4a] sm:$0xff] }
  0x26   : > { %v5805_v33 = vld [vmem:[%s5639_s11 + $0xf9] sm:$0xff]  ;;  %v5811_v35 = vld [vmem:[%s5639_s11 + $0x109] sm:$0xff]  ;;  %v5825_v37 = vld [vmem:[%s5639_s11 + $0x111] sm:$0xff] }
  0x27   : > { %4703 = vmatmul.mubr.msk.f32.gmra.mrb[4].mxu1 %vm310_vm0, %v5661_v11  ;;  %4903 = vmatmul.mubr.msk.f32.gmra.mrb[4].mxu0 %vm310_vm0, %v5678_v13  ;;  %6726 = vst [vmem:[#allocation7_spill] sm:$0xff] %v5805_v33  ;;  %v5808_v34 = vld [vmem:[%s5639_s11 + $0x52] sm:$0xff]  ;;  %6727 = vst [vmem:[#allocation8_spill] sm:$0xff] %v5811_v35  ;;  %v5814_v36 = vld [vmem:[%s5639_s11 + $0x62] sm:$0xff] }
  0x28   : > { %4705 = vmatprep.mubr.msk.f32.mxu1 %vm310_vm0, %v5667_v12  ;;  %4905 = vmatprep.mubr.msk.f32.mxu0 %vm310_vm0, %v5681_v14  ;;  %6728 = vst [vmem:[#allocation9_spill] sm:$0xff] %v5825_v37  ;;  %v5828_v38 = vld [vmem:[%s5639_s11 + $0x6a] sm:$0xff]  ;;  %v5831_v39 = vld [vmem:[%s5639_s11 + $0x121] sm:$0xff]  ;;  %v5851_v43 = vld [vmem:[%s5639_s11 + $0x139] sm:$0xff] }
  0x29   : > { %6729 = vst [vmem:[#allocation10_spill] sm:$0xff] %v5831_v39  ;;  %v5834_v40 = vld [vmem:[%s5639_s11 + $0x7a] sm:$0xff]  ;;  %v5845_v41 = vld [vmem:[%s5639_s11 + $0x129] sm:$0xff]  ;;  %6731 = vst [vmem:[#allocation12_spill] sm:$0xff] %v5851_v43 }
  0x2a   : > { %6730 = vst [vmem:[#allocation11_spill] sm:$0xff] %v5845_v41  ;;  %v5848_v42 = vld [vmem:[%s5639_s11 + $0x82] sm:$0xff]  ;;  %v5854_v44 = vld [vmem:[%s5639_s11 + $0x92] sm:$0xff]  ;;  %v5868_v46 = vld [vmem:[%s5639_s11 + $0x9a] sm:$0xff] }
  0x2b   : > { %4706 = vmatmul.mubr.msk.f32.gmra.mrb[6].mxu1 %vm310_vm0, %v5678_v13  ;;  %4906 = vmatmul.mubr.msk.f32.gmra.mrb[6].mxu0 %vm310_vm0, %v5692_v15  ;;  %v5865_v45 = vld [vmem:[%s5639_s11 + $0x141] sm:$0xff]  ;;  %v5871_v47 = vld [vmem:[%s5639_s11 + $0x151] sm:$0xff]  ;;  %v5885_v49 = vld [vmem:[%s5639_s11 + $0x159] sm:$0xff] }
  0x2c   : > { %4708 = vmatprep.mubr.msk.f32.mxu1 %vm310_vm0, %v5681_v14  ;;  %4908 = vmatprep.mubr.msk.f32.mxu0 %vm310_vm0, %v5695_v16  ;;  %6732 = vst [vmem:[#allocation13_spill] sm:$0xff] %v5865_v45  ;;  %6733 = vst [vmem:[#allocation14_spill] sm:$0xff] %v5871_v47  ;;  %v5874_v48 = vld [vmem:[%s5639_s11 + $0xaa] sm:$0xff]  ;;  %v5888_v50 = vld [vmem:[%s5639_s11 + $0xb2] sm:$0xff] }
  0x2d   : > { %6734 = vst [vmem:[#allocation15_spill] sm:$0xff] %v5885_v49  ;;  %v5891_v51 = vld [vmem:[%s5639_s11 + $0x169] sm:$0xff]  ;;  %v5905_v53 = vld [vmem:[%s5639_s11 + $0x171] sm:$0xff]  ;;  %v243_v55 = vld [vmem:[%s5639_s11] sm:$0xff] }
  0x2e   : > { %6735 = vst [vmem:[#allocation16_spill] sm:$0xff] %v5891_v51  ;;  %v5894_v52 = vld [vmem:[%s5639_s11 + $0xc2] sm:$0xff]  ;;  %6736 = vst [vmem:[#allocation17_spill] sm:$0xff] %v5905_v53  ;;  %v5908_v54 = vld [vmem:[%s5639_s11 + $0xca] sm:$0xff] }
  0x2f   : > { %4709 = vmatmul.mubr.msk.f32.gmra.mrb[8].mxu1 %vm310_vm0, %v5692_v15  ;;  %4909 = vmatmul.mubr.msk.f32.gmra.mrb[8].mxu0 %vm310_vm0, %v5706_v17  ;;  %v5912_v56 = vld [vmem:[%s5639_s11 + $0xda] sm:$0xff]  ;;  %v244_v57 = vld [vmem:[%s5639_s11 + $0x8] sm:$0xff]  ;;  %v5929_v60 = vld [vmem:[%s5639_s11 + $0xf2] sm:$0xff] }
  0x30   : > { %4711 = vmatprep.mubr.msk.f32.mxu1 %vm310_vm0, %v5695_v16  ;;  %4911 = vmatprep.mubr.msk.f32.mxu0 %vm310_vm0, %v5709_v18  ;;  %v5923_v58 = vld [vmem:[%s5639_s11 + $0xe2] sm:$0xff]  ;;  %v5926_v59 = vld [vmem:[%s5639_s11 + $0x18] sm:$0xff]  ;;  %v5951_v0 = vld [vmem:[%s5639_s11 + $0x30] sm:$0xff] }
  0x31   : > { %6737 = vst [vmem:[#allocation18_spill] sm:$0xff] %v5926_v59  ;;  %v5943_v62 = vld [vmem:[%s5639_s11 + $0x20] sm:$0xff]  ;;  %6739 = vst [vmem:[#allocation20_spill] sm:$0xff] %v5951_v0  ;;  %v5954_v2 = vld [vmem:[%s5639_s11 + $0x10a] sm:$0xff] }
  0x32   : > { %6738 = vst [vmem:[#allocation19_spill] sm:$0xff] %v5943_v62  ;;  %v5946_v63 = vld [vmem:[%s5639_s11 + $0xfa] sm:$0xff]  ;;  %v5969_v4 = vld [vmem:[%s5639_s11 + $0x112] sm:$0xff]  ;;  %v5972_v5 = vld [vmem:[%s5639_s11 + $0x48] sm:$0xff] }
  0x33   : > { %4712 = vmatmul.mubr.msk.f32.gmra.mrb[10].mxu1 %vm310_vm0, %v5706_v17  ;;  %4912 = vmatmul.mubr.msk.f32.gmra.mrb[10].mxu0 %vm310_vm0, %v5720_v19  ;;  %v5966_v3 = vld [vmem:[%s5639_s11 + $0x38] sm:$0xff]  ;;  %6741 = vst [vmem:[#allocation22_spill] sm:$0xff] %v5972_v5  ;;  %v5975_v6 = vld [vmem:[%s5639_s11 + $0x122] sm:$0xff]  ;;  %v5986_v7 = vld [vmem:[%s5639_s11 + $0x50] sm:$0xff] }
  0x34   : > { %4714 = vmatprep.mubr.msk.f32.mxu1 %vm310_vm0, %v5709_v18  ;;  %4914 = vmatprep.mubr.msk.f32.mxu0 %vm310_vm0, %v5723_v20  ;;  %6740 = vst [vmem:[#allocation21_spill] sm:$0xff] %v5966_v3  ;;  %6742 = vst [vmem:[#allocation23_spill] sm:$0xff] %v5986_v7 }
  0x37   : > { %4715 = vmatmul.mubr.msk.f32.gmra.mrb[12].mxu1 %vm310_vm0, %v5720_v19  ;;  %4915 = vmatmul.mubr.msk.f32.gmra.mrb[12].mxu0 %vm310_vm0, %v5734_v21 }
  0x38   : > { %4717 = vmatprep.mubr.msk.f32.mxu1 %vm310_vm0, %v5723_v20  ;;  %4917 = vmatprep.mubr.msk.f32.mxu0 %vm310_vm0, %v5737_v22 }
  0x3b   : > { %4718 = vmatmul.mubr.msk.f32.gmra.mrb[14].mxu1 %vm310_vm0, %v5734_v21  ;;  %4918 = vmatmul.mubr.msk.f32.gmra.mrb[14].mxu0 %vm310_vm0, %v5748_v23 }
  0x3c   : > { %4720 = vmatprep.mubr.msk.f32.mxu1 %vm310_vm0, %v5737_v22  ;;  %4946 = vmatprep.mubr.msk.f32.mxu0 %vm310_vm0, %v5751_v24 }
  0x3f   : > { %4721 = vmatmul.mubr.msk.f32.gmra.mrb[16].mxu1 %vm310_vm0, %v5748_v23  ;;  %4947 = vmatmul.mubr.msk.f32.vlgmr.msra.gmra.mrb[0].mxu0 %vm310_vm0, %v5762_v25 }
  0x40   : > { %4995 = vmatpush3.msra.mxu0 %v4227_v9  ;;  %4723 = vmatprep.mubr.msk.f32.mxu1 %vm310_vm0, %v5765_v26  ;;  %v5989_v9 = vld [vmem:[%s5639_s11 + $0x12a] sm:$0xff] }
  0x41   : > { %4949 = vmatprep.mubr.msk.f32.mxu0 %vm310_vm0, %v5768_v27  ;;  %5044 = vmatprep.subr.mxu0 %v5773_v28 }
  0x43   : > { %4724 = vmatmul.mubr.msk.f32.gmra.mrb[18].mxu1 %vm310_vm0, %v5782_v29  ;;  %4950 = vmatmul.mubr.msk.f32.gmra.mrb[2].mxu0 %vm310_vm0, %v5785_v30  ;;  %v6086_v29 = vld [vmem:[%s5639_s11 + $0xd8] sm:$0xff] }
  0x44   : > { %4726 = vmatprep.mubr.msk.f32.mxu1 %vm310_vm0, %v5790_v31  ;;  %4952 = vmatprep.mubr.msk.f32.mxu0 %vm310_vm0, %v5793_v32  ;;  %v6069_v31 = vld [vmem:[%s5639_s11 + $0x18a] sm:$0xff] }
  0x45   : > { %6753 = vst [vmem:[#allocation34_spill] sm:$0xff] %v6069_v31 }
  0x47   : > { %4727 = vmatmul.mubr.msk.f32.gmra.mrb[20].mxu1 %vm310_vm0, %v5805_v33  ;;  %4953 = vmatmul.mubr.msk.f32.gmra.mrb[4].mxu0 %vm310_vm0, %v5808_v34  ;;  %v6055_v33 = vld [vmem:[%s5639_s11 + $0x182] sm:$0xff] }
  0x48   : > { %4729 = vmatprep.mubr.msk.f32.mxu1 %vm310_vm0, %v5811_v35  ;;  %4955 = vmatprep.mubr.msk.f32.mxu0 %vm310_vm0, %v5814_v36  ;;  %v6052_v35 = vld [vmem:[%s5639_s11 + $0xa8] sm:$0xff]  ;;  %6751 = vst [vmem:[#allocation32_spill] sm:$0xff] %v6055_v33 }
  0x49   : > { %6750 = vst [vmem:[#allocation31_spill] sm:$0xff] %v6052_v35 }
  0x4b   : > { %4730 = vmatmul.mubr.msk.f32.gmra.mrb[22].mxu1 %vm310_vm0, %v5825_v37  ;;  %4956 = vmatmul.mubr.msk.f32.gmra.mrb[6].mxu0 %vm310_vm0, %v5828_v38  ;;  %v6049_v37 = vld [vmem:[%s5639_s11 + $0x172] sm:$0xff] }
  0x4c   : > { %4732 = vmatprep.mubr.msk.f32.mxu1 %vm310_vm0, %v5831_v39  ;;  %4958 = vmatprep.mubr.msk.f32.mxu0 %vm310_vm0, %v5834_v40  ;;  %v6046_v39 = vld [vmem:[%s5639_s11 + $0x98] sm:$0xff]  ;;  %6749 = vst [vmem:[#allocation30_spill] sm:$0xff] %v6049_v37 }
  0x4d   : > { %6748 = vst [vmem:[#allocation29_spill] sm:$0xff] %v6046_v39 }
  0x4f   : > { %4733 = vmatmul.mubr.msk.f32.gmra.mrb[24].mxu1 %vm310_vm0, %v5845_v41  ;;  %4959 = vmatmul.mubr.msk.f32.gmra.mrb[8].mxu0 %vm310_vm0, %v5848_v42  ;;  %v6035_v41 = vld [vmem:[%s5639_s11 + $0x16a] sm:$0xff] }
  0x50   : > { %4735 = vmatprep.mubr.msk.f32.mxu1 %vm310_vm0, %v5851_v43  ;;  %4961 = vmatprep.mubr.msk.f32.mxu0 %vm310_vm0, %v5854_v44  ;;  %v6032_v43 = vld [vmem:[%s5639_s11 + $0x90] sm:$0xff] }
  0x51   : > { %6747 = vst [vmem:[#allocation28_spill] sm:$0xff] %v6032_v43 }
  0x53   : > { %4736 = vmatmul.mubr.msk.f32.gmra.mrb[26].mxu1 %vm310_vm0, %v5865_v45  ;;  %4962 = vmatmul.mubr.msk.f32.gmra.mrb[10].mxu0 %vm310_vm0, %v5868_v46  ;;  %v6029_v45 = vld [vmem:[%s5639_s11 + $0x15a] sm:$0xff] }
  0x54   : > { %4738 = vmatprep.mubr.msk.f32.mxu1 %vm310_vm0, %v5871_v47  ;;  %4964 = vmatprep.mubr.msk.f32.mxu0 %vm310_vm0, %v5874_v48  ;;  %v6026_v47 = vld [vmem:[%s5639_s11 + $0x80] sm:$0xff] }
  0x55   : > { %6746 = vst [vmem:[#allocation27_spill] sm:$0xff] %v6026_v47 }
  0x57   : > { %4739 = vmatmul.mubr.msk.f32.gmra.mrb[28].mxu1 %vm310_vm0, %v5885_v49  ;;  %4965 = vmatmul.mubr.msk.f32.gmra.mrb[12].mxu0 %vm310_vm0, %v5888_v50  ;;  %v6015_v49 = vld [vmem:[%s5639_s11 + $0x152] sm:$0xff] }
  0x58   : > { %4741 = vmatprep.mubr.msk.f32.mxu1 %vm310_vm0, %v5891_v51  ;;  %4967 = vmatprep.mubr.msk.f32.mxu0 %vm310_vm0, %v5894_v52  ;;  %v6012_v51 = vld [vmem:[%s5639_s11 + $0x78] sm:$0xff] }
  0x59   : > { %6745 = vst [vmem:[#allocation26_spill] sm:$0xff] %v6012_v51 }
  0x5b   : > { %4742 = vmatmul.mubr.msk.f32.gmra.mrb[30].mxu1 %vm310_vm0, %v5905_v53  ;;  %4968 = vmatmul.mubr.msk.f32.gmra.mrb[14].mxu0 %vm310_vm0, %v5908_v54  ;;  %v6009_v53 = vld [vmem:[%s5639_s11 + $0x142] sm:$0xff] }
  0x5c   : > { %4746 = vmatprep.mubr.msk.f32.mxu1 %vm310_vm0, %v243_v55  ;;  %4970 = vmatprep.mubr.msk.f32.mxu0 %vm310_vm0, %v5912_v56  ;;  %v5995_v55 = vld [vmem:[%s5639_s11 + $0x13a] sm:$0xff] }
  0x5f   : > { %4747 = vmatmul.mubr.msk.f32.vlgmr.msra.gmra.mrb[0].mxu1 %vm310_vm0, %v244_v57  ;;  %4971 = vmatmul.mubr.msk.f32.gmra.mrb[16].mxu0 %vm310_vm0, %v5923_v58  ;;  %v6006_v57 = vld [vmem:[%s5639_s11 + $0x68] sm:$0xff] }
  0x60   : > { %4795 = vmatpush3.msra.mxu1 %v5658_v10  ;;  %4749 = vmatprep.mubr.msk.f32.mxu1 %vm310_vm0, %v5926_v59  ;;  %v5992_v10 = vld [vmem:[%s5639_s11 + $0x60] sm:$0xff]  ;;  %6744 = vst [vmem:[#allocation25_spill] sm:$0xff] %v6006_v57 }
  0x61   : > { %4973 = vmatprep.mubr.msk.f32.mxu0 %vm310_vm0, %v5929_v60  ;;  %4844 = vmatprep.subr.mxu1 %v5934_v61  ;;  %6743 = vst [vmem:[#allocation24_spill] sm:$0xff] %v5992_v10  ;;  %v6072_v59 = vld [vmem:[%s5639_s11 + $0xc0] sm:$0xff] }
  0x63   : > { %4750 = vmatmul.mubr.msk.f32.gmra.mrb[2].mxu1 %vm310_vm0, %v5943_v62  ;;  %4974 = vmatmul.mubr.msk.f32.gmra.mrb[18].mxu0 %vm310_vm0, %v5946_v63  ;;  %v6066_v62 = vld [vmem:[%s5639_s11 + $0xb0] sm:$0xff] }
  0x64   : > { %4752 = vmatprep.mubr.msk.f32.mxu1 %vm310_vm0, %v5951_v0  ;;  %4976 = vmatprep.mubr.msk.f32.mxu0 %vm310_vm0, %v5954_v2  ;;  %6752 = vst [vmem:[#allocation33_spill] sm:$0xff] %v6066_v62 }
  0x67   : > { %4753 = vmatmul.mubr.msk.f32.gmra.mrb[4].mxu1 %vm310_vm0, %v5966_v3  ;;  %4977 = vmatmul.mubr.msk.f32.gmra.mrb[20].mxu0 %vm310_vm0, %v5969_v4 }
  0x68   : > { %4755 = vmatprep.mubr.msk.f32.mxu1 %vm310_vm0, %v5972_v5  ;;  %4979 = vmatprep.mubr.msk.f32.mxu0 %vm310_vm0, %v5975_v6 }
  0x6b   : > { %4756 = vmatmul.mubr.msk.f32.gmra.mrb[6].mxu1 %vm310_vm0, %v5986_v7  ;;  %4980 = vmatmul.mubr.msk.f32.gmra.mrb[22].mxu0 %vm310_vm0, %v5989_v9 }
  0x6c   : > { %4758 = vmatprep.mubr.msk.f32.mxu1 %vm310_vm0, %v5992_v10  ;;  %4982 = vmatprep.mubr.msk.f32.mxu0 %vm310_vm0, %v5995_v55 }
  0x6f   : > { %4759 = vmatmul.mubr.msk.f32.gmra.mrb[8].mxu1 %vm310_vm0, %v6006_v57  ;;  %4983 = vmatmul.mubr.msk.f32.gmra.mrb[24].mxu0 %vm310_vm0, %v6009_v53 }
  0x70   : > { %4761 = vmatprep.mubr.msk.f32.mxu1 %vm310_vm0, %v6012_v51  ;;  %4985 = vmatprep.mubr.msk.f32.mxu0 %vm310_vm0, %v6015_v49 }
  0x73   : > { %4762 = vmatmul.mubr.msk.f32.gmra.mrb[10].mxu1 %vm310_vm0, %v6026_v47  ;;  %4986 = vmatmul.mubr.msk.f32.gmra.mrb[26].mxu0 %vm310_vm0, %v6029_v45 }
  0x74   : > { %4764 = vmatprep.mubr.msk.f32.mxu1 %vm310_vm0, %v6032_v43  ;;  %4988 = vmatprep.mubr.msk.f32.mxu0 %vm310_vm0, %v6035_v41 }
  0x77   : > { %4765 = vmatmul.mubr.msk.f32.gmra.mrb[12].mxu1 %vm310_vm0, %v6046_v39  ;;  %4989 = vmatmul.mubr.msk.f32.gmra.mrb[28].mxu0 %vm310_vm0, %v6049_v37  ;;  %v6091_v37 = vld [vmem:[%s6674_s1 + $0x40] sm:$0xff] }
  0x78   : > { %4767 = vmatprep.mubr.msk.f32.mxu1 %vm310_vm0, %v6052_v35  ;;  %4991 = vmatprep.mubr.msk.f32.mxu0 %vm310_vm0, %v6055_v33  ;;  %v6083_v33 = vld [vmem:[%s5639_s11 + $0xc8] sm:$0xff] }
  0x79   : > { %6754 = vst [vmem:[#allocation35_spill] sm:$0xff] %v6083_v33 }
  0x7b   : > { %4768 = vmatmul.mubr.msk.f32.gmra.mrb[14].mxu1 %vm310_vm0, %v6066_v62  ;;  %4992 = vmatmul.mubr.msk.f32.gmra.mrb[30].mxu0 %vm310_vm0, %v6069_v31  ;;  %v6101_v31 = vld [vmem:[%s5639_s11 + $0xe0] sm:$0xff] }
  0x7c   : > { %4770 = vmatprep.mubr.msk.f32.mxu1 %vm310_vm0, %v6072_v59  ;;  %4996 = vmatprep.mubr.msk.f32.mxu0 %vm310_vm0, %v5951_v0  ;;  %v6106_v0 = vld [vmem:[%s5639_s11 + $0xf0] sm:$0xff] }
  0x7f   : > { %4771 = vmatmul.mubr.msk.f32.gmra.mrb[16].mxu1 %vm310_vm0, %v6083_v33  ;;  %4997 = vmatmul.mubr.msk.f32.vlgmr.msra.gmra.mrb[0].mxu0 %vm310_vm0, %v5966_v3  ;;  %v953_v3 = vld [vmem:[%s5639_s11 + $0x2] sm:$0xff] }
  0x80   : > { %5045 = vmatpush3.msra.mxu0 %v5773_v28  ;;  %4773 = vmatprep.mubr.msk.f32.mxu1 %vm310_vm0, %v6086_v29  ;;  %v6118_v28 = vld [vmem:[%s5639_s11 + $0xf8] sm:$0xff] }
  0x81   : > { %4999 = vmatprep.mubr.msk.f32.mxu0 %vm310_vm0, %v5972_v5  ;;  %5094 = vmatprep.subr.mxu0 %v6091_v37  ;;  %v6121_v5 = vld [vmem:[%s5639_s11 + $0x108] sm:$0xff] }
  0x83   : > { %4774 = vmatmul.mubr.msk.f32.gmra.mrb[18].mxu1 %vm310_vm0, %v6101_v31  ;;  %5000 = vmatmul.mubr.msk.f32.gmra.mrb[2].mxu0 %vm310_vm0, %v5986_v7  ;;  %v6132_v7 = vld [vmem:[%s5639_s11 + $0x110] sm:$0xff] }
  0x84   : > { %4776 = vmatprep.mubr.msk.f32.mxu1 %vm310_vm0, %v6106_v0  ;;  %5002 = vmatprep.mubr.msk.f32.mxu0 %vm310_vm0, %v5992_v10  ;;  %v6135_v10 = vld [vmem:[%s5639_s11 + $0x120] sm:$0xff] }
  0x87   : > { %4777 = vmatmul.mubr.msk.f32.gmra.mrb[20].mxu1 %vm310_vm0, %v6118_v28  ;;  %5003 = vmatmul.mubr.msk.f32.gmra.mrb[4].mxu0 %vm310_vm0, %v6006_v57  ;;  %v6146_v57 = vld [vmem:[%s5639_s11 + $0x128] sm:$0xff] }
  0x88   : > { %4779 = vmatprep.mubr.msk.f32.mxu1 %vm310_vm0, %v6121_v5  ;;  %5005 = vmatprep.mubr.msk.f32.mxu0 %vm310_vm0, %v6012_v51  ;;  %v6149_v51 = vld [vmem:[%s5639_s11 + $0x138] sm:$0xff] }
  0x8b   : > { %4780 = vmatmul.mubr.msk.f32.gmra.mrb[22].mxu1 %vm310_vm0, %v6132_v7  ;;  %5006 = vmatmul.mubr.msk.f32.gmra.mrb[6].mxu0 %vm310_vm0, %v6026_v47  ;;  %v6160_v47 = vld [vmem:[%s5639_s11 + $0x140] sm:$0xff] }
  0x8c   : > { %4782 = vmatprep.mubr.msk.f32.mxu1 %vm310_vm0, %v6135_v10  ;;  %5008 = vmatprep.mubr.msk.f32.mxu0 %vm310_vm0, %v6032_v43  ;;  %v6163_v43 = vld [vmem:[%s5639_s11 + $0x150] sm:$0xff] }
  0x8f   : > { %4783 = vmatmul.mubr.msk.f32.gmra.mrb[24].mxu1 %vm310_vm0, %v6146_v57  ;;  %5009 = vmatmul.mubr.msk.f32.gmra.mrb[8].mxu0 %vm310_vm0, %v6046_v39  ;;  %v6174_v39 = vld [vmem:[%s5639_s11 + $0x158] sm:$0xff] }
  0x90   : > { %4785 = vmatprep.mubr.msk.f32.mxu1 %vm310_vm0, %v6149_v51  ;;  %5011 = vmatprep.mubr.msk.f32.mxu0 %vm310_vm0, %v6052_v35  ;;  %v6177_v35 = vld [vmem:[%s5639_s11 + $0x168] sm:$0xff] }
  0x93   : > { %4786 = vmatmul.mubr.msk.f32.gmra.mrb[26].mxu1 %vm310_vm0, %v6160_v47  ;;  %5012 = vmatmul.mubr.msk.f32.gmra.mrb[10].mxu0 %vm310_vm0, %v6066_v62  ;;  %v6188_v62 = vld [vmem:[%s5639_s11 + $0x170] sm:$0xff] }
  0x94   : > { %4788 = vmatprep.mubr.msk.f32.mxu1 %vm310_vm0, %v6163_v43  ;;  %5014 = vmatprep.mubr.msk.f32.mxu0 %vm310_vm0, %v6072_v59 }
  0x97   : > { %4789 = vmatmul.mubr.msk.f32.gmra.mrb[28].mxu1 %vm310_vm0, %v6174_v39  ;;  %5015 = vmatmul.mubr.msk.f32.gmra.mrb[12].mxu0 %vm310_vm0, %v6083_v33  ;;  %v954_v33 = vld [vmem:[%s5639_s11 + $0xa] sm:$0xff] }
  0x98   : > { %4791 = vmatprep.mubr.msk.f32.mxu1 %vm310_vm0, %v6177_v35  ;;  %5017 = vmatprep.mubr.msk.f32.mxu0 %vm310_vm0, %v6086_v29 }
  0x9b   : > { %4792 = vmatmul.mubr.msk.f32.gmra.mrb[30].mxu1 %vm310_vm0, %v6188_v62  ;;  %5018 = vmatmul.mubr.msk.f32.gmra.mrb[14].mxu0 %vm310_vm0, %v6101_v31 }
  0x9c   : > { %4796 = vmatprep.mubr.msk.f32.mxu1 %vm310_vm0, %v953_v3  ;;  %5020 = vmatprep.mubr.msk.f32.mxu0 %vm310_vm0, %v6106_v0  ;;  %v6771_v3 = vld [vmem:[#allocation25_spill] sm:$0xff] }
  0x9f   : > { %4797 = vmatmul.mubr.msk.f32.vlgmr.msra.gmra.mrb[0].mxu1 %vm310_vm0, %v954_v33  ;;  %5021 = vmatmul.mubr.msk.f32.gmra.mrb[16].mxu0 %vm310_vm0, %v6118_v28  ;;  %v4225_v33 = vld [vmem:[%s5639_s11 + $0x198] sm:$0xff] }
  0xa0   : > { %4845 = vmatpush3.msra.mxu1 %v5934_v61  ;;  %4799 = vmatprep.mubr.msk.f32.mxu1 %vm310_vm0, %v5751_v24  ;;  %v6241_v24 = vld [vmem:[%s5639_s11 + $0x180] sm:$0xff] }
  0xa1   : > { %5023 = vmatprep.mubr.msk.f32.mxu0 %vm310_vm0, %v6121_v5  ;;  %5144 = vmatprep.subr.mxu1 %v5624_v1  ;;  %v4226_v61 = vld [vmem:[%s5639_s11 + $0x1a0] sm:$0xff] }
  0xa3   : > { %4800 = vmatmul.mubr.msk.f32.gmra.mrb[2].mxu1 %vm310_vm0, %v5762_v25  ;;  %5024 = vmatmul.mubr.msk.f32.gmra.mrb[18].mxu0 %vm310_vm0, %v6132_v7  ;;  %v6252_v25 = vld [vmem:[%s5639_s11 + $0x188] sm:$0xff] }
  0xa4   : > { %4802 = vmatprep.mubr.msk.f32.mxu1 %vm310_vm0, %v5768_v27  ;;  %5026 = vmatprep.mubr.msk.f32.mxu0 %vm310_vm0, %v6135_v10 }
  0xa7   : > { %4803 = vmatmul.mubr.msk.f32.gmra.mrb[4].mxu1 %vm310_vm0, %v5785_v30  ;;  %5027 = vmatmul.mubr.msk.f32.gmra.mrb[20].mxu0 %vm310_vm0, %v6146_v57 }
  0xa8   : > { %4805 = vmatprep.mubr.msk.f32.mxu1 %vm310_vm0, %v5793_v32  ;;  %5029 = vmatprep.mubr.msk.f32.mxu0 %vm310_vm0, %v6149_v51 }
  0xab   : > { %4806 = vmatmul.mubr.msk.f32.gmra.mrb[6].mxu1 %vm310_vm0, %v5808_v34  ;;  %5030 = vmatmul.mubr.msk.f32.gmra.mrb[22].mxu0 %vm310_vm0, %v6160_v47 }
  0xac   : > { %4808 = vmatprep.mubr.msk.f32.mxu1 %vm310_vm0, %v5814_v36  ;;  %5032 = vmatprep.mubr.msk.f32.mxu0 %vm310_vm0, %v6163_v43 }
  0xaf   : > { %4809 = vmatmul.mubr.msk.f32.gmra.mrb[8].mxu1 %vm310_vm0, %v5828_v38  ;;  %5033 = vmatmul.mubr.msk.f32.gmra.mrb[24].mxu0 %vm310_vm0, %v6174_v39 }
  0xb0   : > { %4811 = vmatprep.mubr.msk.f32.mxu1 %vm310_vm0, %v5834_v40  ;;  %5035 = vmatprep.mubr.msk.f32.mxu0 %vm310_vm0, %v6177_v35 }
  0xb3   : > { %4812 = vmatmul.mubr.msk.f32.gmra.mrb[10].mxu1 %vm310_vm0, %v5848_v42  ;;  %5036 = vmatmul.mubr.msk.f32.gmra.mrb[26].mxu0 %vm310_vm0, %v6188_v62 }
  0xb4   : > { %4814 = vmatprep.mubr.msk.f32.mxu1 %vm310_vm0, %v5854_v44  ;;  %5038 = vmatprep.mubr.msk.f32.mxu0 %vm310_vm0, %v6241_v24 }
  0xb7   : > { %4815 = vmatmul.mubr.msk.f32.gmra.mrb[12].mxu1 %vm310_vm0, %v5868_v46  ;;  %5039 = vmatmul.mubr.msk.f32.gmra.mrb[28].mxu0 %vm310_vm0, %v6252_v25 }
  0xb8   : > { %4817 = vmatprep.mubr.msk.f32.mxu1 %vm310_vm0, %v5874_v48  ;;  %5041 = vmatprep.mubr.msk.f32.mxu0 %vm310_vm0, %v4225_v33  ;;  %v6772_v33 = vld [vmem:[#allocation13_spill] sm:$0xff] }
  0xbb   : > { %4818 = vmatmul.mubr.msk.f32.gmra.mrb[14].mxu1 %vm310_vm0, %v5888_v50  ;;  %5042 = vmatmul.mubr.msk.f32.gmra.mrb[30].mxu0 %vm310_vm0, %v4226_v61  ;;  %v6773_v61 = vld [vmem:[#allocation26_spill] sm:$0xff] }
  0xbc   : > { %4820 = vmatprep.mubr.msk.f32.mxu1 %vm310_vm0, %v5894_v52  ;;  %5046 = vmatprep.mubr.msk.f32.mxu0 %vm310_vm0, %v5648_v8  ;;  %v6755_v8 = vld [vmem:[#allocation30_spill] sm:$0xff] }
  0xbf   : > { %4821 = vmatmul.mubr.msk.f32.gmra.mrb[16].mxu1 %vm310_vm0, %v5908_v54  ;;  %5047 = vmatmul.mubr.msk.f32.vlgmr.msra.gmra.mrb[0].mxu0 %vm310_vm0, %v5661_v11  ;;  %v6756_v11 = vld [vmem:[#allocation5_spill] sm:$0xff] }
  0xc0   : > { %5095 = vmatpush3.msra.mxu0 %v6091_v37  ;;  %4823 = vmatprep.mubr.msk.f32.mxu1 %vm310_vm0, %v5912_v56  ;;  %v6770_v37 = vld [vmem:[#allocation12_spill] sm:$0xff] }
  0xc1   : > { %5049 = vmatprep.mubr.msk.f32.mxu0 %vm310_vm0, %v5667_v12  ;;  %v6757_v12 = vld [vmem:[#allocation18_spill] sm:$0xff] }
  0xc3   : > { %4824 = vmatmul.mubr.msk.f32.gmra.mrb[18].mxu1 %vm310_vm0, %v5923_v58  ;;  %5050 = vmatmul.mubr.msk.f32.gmra.mrb[2].mxu0 %vm310_vm0, %v5678_v13  ;;  %v6758_v13 = vld [vmem:[#allocation6_spill] sm:$0xff] }
  0xc4   : > { %4826 = vmatprep.mubr.msk.f32.mxu1 %vm310_vm0, %v5929_v60  ;;  %5052 = vmatprep.mubr.msk.f32.mxu0 %vm310_vm0, %v5681_v14  ;;  %v6759_v14 = vld [vmem:[#allocation19_spill] sm:$0xff] }
  0xc7   : > { %4827 = vmatmul.mubr.msk.f32.gmra.mrb[20].mxu1 %vm310_vm0, %v5946_v63  ;;  %5053 = vmatmul.mubr.msk.f32.gmra.mrb[4].mxu0 %vm310_vm0, %v5692_v15  ;;  %v6760_v15 = vld [vmem:[#allocation7_spill] sm:$0xff] }
  0xc8   : > { %4829 = vmatprep.mubr.msk.f32.mxu1 %vm310_vm0, %v5954_v2  ;;  %5055 = vmatprep.mubr.msk.f32.mxu0 %vm310_vm0, %v5695_v16  ;;  %v6761_v16 = vld [vmem:[#allocation20_spill] sm:$0xff] }
  0xcb   : > { %4830 = vmatmul.mubr.msk.f32.gmra.mrb[22].mxu1 %vm310_vm0, %v5969_v4  ;;  %5056 = vmatmul.mubr.msk.f32.gmra.mrb[6].mxu0 %vm310_vm0, %v5706_v17  ;;  %v6762_v17 = vld [vmem:[#allocation8_spill] sm:$0xff] }
  0xcc   : > { %4832 = vmatprep.mubr.msk.f32.mxu1 %vm310_vm0, %v5975_v6  ;;  %5058 = vmatprep.mubr.msk.f32.mxu0 %vm310_vm0, %v5709_v18  ;;  %v6763_v18 = vld [vmem:[#allocation21_spill] sm:$0xff] }
  0xcf   : > { %4833 = vmatmul.mubr.msk.f32.gmra.mrb[24].mxu1 %vm310_vm0, %v5989_v9  ;;  %5059 = vmatmul.mubr.msk.f32.gmra.mrb[8].mxu0 %vm310_vm0, %v5720_v19  ;;  %v6764_v19 = vld [vmem:[#allocation9_spill] sm:$0xff] }
  0xd0   : > { %4835 = vmatprep.mubr.msk.f32.mxu1 %vm310_vm0, %v5995_v55  ;;  %5061 = vmatprep.mubr.msk.f32.mxu0 %vm310_vm0, %v5723_v20  ;;  %v6765_v20 = vld [vmem:[#allocation22_spill] sm:$0xff] }
  0xd3   : > { %4836 = vmatmul.mubr.msk.f32.gmra.mrb[26].mxu1 %vm310_vm0, %v6009_v53  ;;  %5062 = vmatmul.mubr.msk.f32.gmra.mrb[10].mxu0 %vm310_vm0, %v5734_v21  ;;  %v6766_v21 = vld [vmem:[#allocation10_spill] sm:$0xff] }
  0xd4   : > { %4838 = vmatprep.mubr.msk.f32.mxu1 %vm310_vm0, %v6015_v49  ;;  %5064 = vmatprep.mubr.msk.f32.mxu0 %vm310_vm0, %v5737_v22  ;;  %v6768_v22 = vld [vmem:[#allocation11_spill] sm:$0xff] }
  0xd7   : > { %4839 = vmatmul.mubr.msk.f32.gmra.mrb[28].mxu1 %vm310_vm0, %v6029_v45  ;;  %5065 = vmatmul.mubr.msk.f32.gmra.mrb[12].mxu0 %vm310_vm0, %v5748_v23  ;;  %v6769_v23 = vld [vmem:[#allocation24_spill] sm:$0xff] }
  0xd8   : > { %4841 = vmatprep.mubr.msk.f32.mxu1 %vm310_vm0, %v6035_v41  ;;  %5067 = vmatprep.mubr.msk.f32.mxu0 %vm310_vm0, %v5765_v26 }
  0xdb   : > { %4842 = vmatmul.mubr.msk.f32.gmra.mrb[30].mxu1 %vm310_vm0, %v6755_v8  ;;  %5068 = vmatmul.mubr.msk.f32.gmra.mrb[14].mxu0 %vm310_vm0, %v6756_v11  ;;  %v6782_v8 = vld [vmem:[#allocation33_spill] sm:$0xff] }
  0xdc   : > { %4846 = vmatprep.mubr.msk.f32.mxu1 %vm310_vm0, %v6757_v12  ;;  %5070 = vmatprep.mubr.msk.f32.mxu0 %vm310_vm0, %v6758_v13  ;;  %v6774_v12 = vld [vmem:[#allocation14_spill] sm:$0xff] }
  0xdf   : > { %4847 = vmatmul.mubr.msk.f32.vlgmr.msra.gmra.mrb[0].mxu1 %vm310_vm0, %v6759_v14  ;;  %5071 = vmatmul.mubr.msk.f32.gmra.mrb[16].mxu0 %vm310_vm0, %v6760_v15  ;;  %v6775_v14 = vld [vmem:[#allocation27_spill] sm:$0xff] }
  0xe0   : > { %5145 = vmatpush3.msra.mxu1 %v5624_v1  ;;  %4849 = vmatprep.mubr.msk.f32.mxu1 %vm310_vm0, %v6761_v16  ;;  %v6767_v1 = vld [vmem:[#allocation23_spill] sm:$0xff] }
  0xe1   : > { %5073 = vmatprep.mubr.msk.f32.mxu0 %vm310_vm0, %v6762_v17  ;;  %v6776_v16 = vld [vmem:[#allocation15_spill] sm:$0xff] }
  0xe3   : > { %4850 = vmatmul.mubr.msk.f32.gmra.mrb[2].mxu1 %vm310_vm0, %v6763_v18  ;;  %5074 = vmatmul.mubr.msk.f32.gmra.mrb[18].mxu0 %vm310_vm0, %v6764_v19  ;;  %v6777_v18 = vld [vmem:[#allocation28_spill] sm:$0xff] }
  0xe4   : > { %4852 = vmatprep.mubr.msk.f32.mxu1 %vm310_vm0, %v6765_v20  ;;  %5076 = vmatprep.mubr.msk.f32.mxu0 %vm310_vm0, %v6766_v21  ;;  %v6778_v20 = vld [vmem:[#allocation16_spill] sm:$0xff] }
  0xe7   : > { %4853 = vmatmul.mubr.msk.f32.gmra.mrb[4].mxu1 %vm310_vm0, %v6767_v1  ;;  %5077 = vmatmul.mubr.msk.f32.gmra.mrb[20].mxu0 %vm310_vm0, %v6768_v22  ;;  %v6377_v1 = vld [vmem:[%s5639_s11 + $0x181] sm:$0xff] }
  0xe8   : > { %4855 = vmatprep.mubr.msk.f32.mxu1 %vm310_vm0, %v6769_v23  ;;  %5079 = vmatprep.mubr.msk.f32.mxu0 %vm310_vm0, %v6770_v37  ;;  %v6779_v23 = vld [vmem:[#allocation29_spill] sm:$0xff] }
  0xeb   : > { %4856 = vmatmul.mubr.msk.f32.gmra.mrb[6].mxu1 %vm310_vm0, %v6771_v3  ;;  %5080 = vmatmul.mubr.msk.f32.gmra.mrb[22].mxu0 %vm310_vm0, %v6772_v33  ;;  %v6780_v3 = vld [vmem:[#allocation17_spill] sm:$0xff] }
  0xec   : > { %4858 = vmatprep.mubr.msk.f32.mxu1 %vm310_vm0, %v6773_v61  ;;  %5082 = vmatprep.mubr.msk.f32.mxu0 %vm310_vm0, %v6774_v12  ;;  %v6781_v61 = vld [vmem:[#allocation31_spill] sm:$0xff] }
  0xef   : > { %4859 = vmatmul.mubr.msk.f32.gmra.mrb[8].mxu1 %vm310_vm0, %v6775_v14  ;;  %5083 = vmatmul.mubr.msk.f32.gmra.mrb[24].mxu0 %vm310_vm0, %v6776_v16  ;;  %v6388_v14 = vld [vmem:[%s5639_s11 + $0x189] sm:$0xff] }
  0xf0   : > { %4861 = vmatprep.mubr.msk.f32.mxu1 %vm310_vm0, %v6777_v18  ;;  %5085 = vmatprep.mubr.msk.f32.mxu0 %vm310_vm0, %v6778_v20  ;;  %v4290_v18 = vld [vmem:[%s5639_s11 + $0x199] sm:$0xff] }
  0xf3   : > { %4862 = vmatmul.mubr.msk.f32.gmra.mrb[10].mxu1 %vm310_vm0, %v6779_v23  ;;  %5086 = vmatmul.mubr.msk.f32.gmra.mrb[26].mxu0 %vm310_vm0, %v6780_v3  ;;  %v4291_v23 = vld [vmem:[%s5639_s11 + $0x1a1] sm:$0xff]  ;;  %v6783_v3 = vld [vmem:[#allocation35_spill] sm:$0xff] }
  0xf4   : > { %4864 = vmatprep.mubr.msk.f32.mxu1 %vm310_vm0, %v6781_v61  ;;  %5088 = vmatprep.mubr.msk.f32.mxu0 %vm310_vm0, %v6377_v1 }
  0xf7   : > { %4865 = vmatmul.mubr.msk.f32.gmra.mrb[12].mxu1 %vm310_vm0, %v6782_v8  ;;  %5089 = vmatmul.mubr.msk.f32.gmra.mrb[28].mxu0 %vm310_vm0, %v6388_v14 }
  0xf8   : > { %4867 = vmatprep.mubr.msk.f32.mxu1 %vm310_vm0, %v6072_v59  ;;  %5091 = vmatprep.mubr.msk.f32.mxu0 %vm310_vm0, %v4290_v18 }
  0xfb   : > { %4868 = vmatmul.mubr.msk.f32.gmra.mrb[14].mxu1 %vm310_vm0, %v6783_v3  ;;  %5092 = vmatmul.mubr.msk.f32.gmra.mrb[30].mxu0 %vm310_vm0, %v4291_v23 }
  0xfc   : > { %4870 = vmatprep.mubr.msk.f32.mxu1 %vm310_vm0, %v6086_v29  ;;  %5096 = vmatprep.mubr.msk.f32.mxu0 %vm310_vm0, %v5768_v27  ;;  %v6785_v27 = vld [vmem:[#allocation32_spill] sm:$0xff] }
  0xfd   : > { %v4355_v29 = vld [vmem:[%s5639_s11 + $0x19a] sm:$0xff] }
  0xff   : > { %4871 = vmatmul.mubr.msk.f32.gmra.mrb[16].mxu1 %vm310_vm0, %v6101_v31  ;;  %5097 = vmatmul.mubr.msk.f32.vlgmr.msra.gmra.mrb[0].mxu0 %vm310_vm0, %v5785_v30  ;;  %v6786_v30 = vld [vmem:[#allocation17_spill] sm:$0xff]  ;;  %v6787_v31 = vld [vmem:[#allocation34_spill] sm:$0xff] }
 0x100   : > { %4873 = vmatprep.mubr.msk.f32.mxu1 %vm310_vm0, %v6106_v0  ;;  %5099 = vmatprep.mubr.msk.f32.mxu0 %vm310_vm0, %v5793_v32  ;;  %v4356_v32 = vld [vmem:[%s5639_s11 + $0x1a2] sm:$0xff]  ;;  %s3782_s11 = sshll.u32 %s6548_s9, 4  ;;  %s6621_s11 = int_to_ptr.vmem [resolvable:$true] %s3782_s11 }
 0x101   : > { %s5460_s23 = scalar_lea.vmem %s6621_s11, 4096  ;;  %p5467_p1 = scmp.lt.s32.totalorder %s6621_s11, %s5465_s27 }
 0x102   : > { %p5461_p12 = scmp.ne.s32.totalorder %s6621_s11, %s5460_s23  ;;  %p5468_p2 = scmp.lt.s32.totalorder %s5466_s28, %s5460_s23 }
 0x103   : > { %4874 = vmatmul.mubr.msk.f32.gmra.mrb[18].mxu1 %vm310_vm0, %v6118_v28  ;;  %5100 = vmatmul.mubr.msk.f32.gmra.mrb[2].mxu0 %vm310_vm0, %v5808_v34 }
 0x104   : > { %4876 = vmatprep.mubr.msk.f32.mxu1 %vm310_vm0, %v6121_v5  ;;  %5102 = vmatprep.mubr.msk.f32.mxu0 %vm310_vm0, %v5814_v36  ;;  %p5462_p13 = pnand %p5461_p12, %p5603_p4  ;;  %p5469_p3 = por %p5468_p2, %p5467_p1 }
 0x106   : > { %p5463_p0 = pneg %p5462_p13 }
 0x107   : > { %4877 = vmatmul.mubr.msk.f32.gmra.mrb[20].mxu1 %vm310_vm0, %v6132_v7  ;;  %5103 = vmatmul.mubr.msk.f32.gmra.mrb[4].mxu0 %vm310_vm0, %v5828_v38 }
 0x108   : > { %4879 = vmatprep.mubr.msk.f32.mxu1 %vm310_vm0, %v6135_v10  ;;  %5105 = vmatprep.mubr.msk.f32.mxu0 %vm310_vm0, %v5834_v40  ;;  %p5470_p5 = pnand %p5469_p3, %p5463_p0 }
 0x10b   : > { %4880 = vmatmul.mubr.msk.f32.gmra.mrb[22].mxu1 %vm310_vm0, %v6146_v57  ;;  %5106 = vmatmul.mubr.msk.f32.gmra.mrb[6].mxu0 %vm310_vm0, %v5848_v42 }
 0x10c   : > { %4882 = vmatprep.mubr.msk.f32.mxu1 %vm310_vm0, %v6149_v51  ;;  %5108 = vmatprep.mubr.msk.f32.mxu0 %vm310_vm0, %v5854_v44 }
 0x10f   : > { %4883 = vmatmul.mubr.msk.f32.gmra.mrb[24].mxu1 %vm310_vm0, %v6160_v47  ;;  %5109 = vmatmul.mubr.msk.f32.gmra.mrb[8].mxu0 %vm310_vm0, %v5868_v46 }
 0x110   : > { %4885 = vmatprep.mubr.msk.f32.mxu1 %vm310_vm0, %v6163_v43  ;;  %5111 = vmatprep.mubr.msk.f32.mxu0 %vm310_vm0, %v5874_v48 }
 0x113   : > { %4886 = vmatmul.mubr.msk.f32.gmra.mrb[26].mxu1 %vm310_vm0, %v6174_v39  ;;  %5112 = vmatmul.mubr.msk.f32.gmra.mrb[10].mxu0 %vm310_vm0, %v5888_v50 }
 0x114   : > { %4888 = vmatprep.mubr.msk.f32.mxu1 %vm310_vm0, %v6177_v35  ;;  %5114 = vmatprep.mubr.msk.f32.mxu0 %vm310_vm0, %v5894_v52  ;;  %v6542_v52 = vld [vmem:[%s6675_s2] ss:$0 sm:$0xff] }
 0x117   : > { %4889 = vmatmul.mubr.msk.f32.gmra.mrb[28].mxu1 %vm310_vm0, %v6188_v62  ;;  %5115 = vmatmul.mubr.msk.f32.gmra.mrb[12].mxu0 %vm310_vm0, %v5908_v54 }
 0x118   : > { %4891 = vmatprep.mubr.msk.f32.mxu1 %vm310_vm0, %v6241_v24  ;;  %5117 = vmatprep.mubr.msk.f32.mxu0 %vm310_vm0, %v5912_v56 }
 0x11b   : > { %4892 = vmatmul.mubr.msk.f32.gmra.mrb[30].mxu1 %vm310_vm0, %v6252_v25  ;;  %5118 = vmatmul.mubr.msk.f32.gmra.mrb[14].mxu0 %vm310_vm0, %v5923_v58 }
 0x11c   : > { %4920 = vmatprep.mubr.msk.f32.mxu1 %vm310_vm0, %v5765_v26  ;;  %5120 = vmatprep.mubr.msk.f32.mxu0 %vm310_vm0, %v5929_v60  ;;  %v6784_v26 = vld [vmem:[#allocation30_spill] sm:$0xff] }
 0x11f   : > { %4921 = vmatmul.mubr.msk.f32.vlgmr.msra.gmra.mrb[16].mxu1 %vm310_vm0, %v6756_v11  ;;  %5121 = vmatmul.mubr.msk.f32.gmra.mrb[16].mxu0 %vm310_vm0, %v5946_v63 }
 0x120   : > { %4923 = vmatprep.mubr.msk.f32.mxu1 %vm310_vm0, %v6758_v13  ;;  %5123 = vmatprep.mubr.msk.f32.mxu0 %vm310_vm0, %v5954_v2 }
 0x123   : > { %4924 = vmatmul.mubr.msk.f32.gmra.mrb[18].mxu1 %vm310_vm0, %v6760_v15  ;;  %5124 = vmatmul.mubr.msk.f32.gmra.mrb[18].mxu0 %vm310_vm0, %v5969_v4 }
 0x124   : > { %4926 = vmatprep.mubr.msk.f32.mxu1 %vm310_vm0, %v6762_v17  ;;  %5126 = vmatprep.mubr.msk.f32.mxu0 %vm310_vm0, %v5975_v6 }
 0x127   : > { %4927 = vmatmul.mubr.msk.f32.gmra.mrb[20].mxu1 %vm310_vm0, %v6764_v19  ;;  %5127 = vmatmul.mubr.msk.f32.gmra.mrb[20].mxu0 %vm310_vm0, %v5989_v9 }
 0x128   : > { %4929 = vmatprep.mubr.msk.f32.mxu1 %vm310_vm0, %v6766_v21  ;;  %5129 = vmatprep.mubr.msk.f32.mxu0 %vm310_vm0, %v5995_v55 }
 0x12b   : > { %4930 = vmatmul.mubr.msk.f32.gmra.mrb[22].mxu1 %vm310_vm0, %v6768_v22  ;;  %5130 = vmatmul.mubr.msk.f32.gmra.mrb[22].mxu0 %vm310_vm0, %v6009_v53 }
 0x12c   : > { %4932 = vmatprep.mubr.msk.f32.mxu1 %vm310_vm0, %v6770_v37  ;;  %5132 = vmatprep.mubr.msk.f32.mxu0 %vm310_vm0, %v6015_v49 }
 0x12f   : > { %4933 = vmatmul.mubr.msk.f32.gmra.mrb[24].mxu1 %vm310_vm0, %v6772_v33  ;;  %5133 = vmatmul.mubr.msk.f32.gmra.mrb[24].mxu0 %vm310_vm0, %v6029_v45 }
 0x130   : > { %4935 = vmatprep.mubr.msk.f32.mxu1 %vm310_vm0, %v6774_v12  ;;  %5135 = vmatprep.mubr.msk.f32.mxu0 %vm310_vm0, %v6035_v41 }
 0x133   : > { %4936 = vmatmul.mubr.msk.f32.gmra.mrb[26].mxu1 %vm310_vm0, %v6776_v16  ;;  %5136 = vmatmul.mubr.msk.f32.gmra.mrb[26].mxu0 %vm310_vm0, %v6784_v26 }
 0x134   : > { %4938 = vmatprep.mubr.msk.f32.mxu1 %vm310_vm0, %v6778_v20  ;;  %5138 = vmatprep.mubr.msk.f32.mxu0 %vm310_vm0, %v6785_v27 }
 0x137   : > { %4939 = vmatmul.mubr.msk.f32.gmra.mrb[28].mxu1 %vm310_vm0, %v6786_v30  ;;  %5139 = vmatmul.mubr.msk.f32.gmra.mrb[28].mxu0 %vm310_vm0, %v6787_v31 }
 0x138   : > { %4941 = vmatprep.mubr.msk.f32.mxu1 %vm310_vm0, %v6377_v1  ;;  %5141 = vmatprep.mubr.msk.f32.mxu0 %vm310_vm0, %v4355_v29 }
 0x13b   : > { %4942 = vmatmul.mubr.msk.f32.gmra.mrb[30].mxu1 %vm310_vm0, %v6388_v14  ;;  %5142 = vmatmul.mubr.msk.f32.gmra.mrb[30].mxu0 %vm310_vm0, %v4356_v32 }
 0x1b2   : > { %v4848_v34 = vpop.f32.mrb[0].mxu1 }
 0x1b3   : > { %v1537_v35 = vpop.f32.mrb[1].mxu1 }
 0x1b6   : > { %v4851_v36 = vpop.f32.mrb[2].mxu1 }
 0x1b7   : > { %v1547_v38 = vpop.f32.mrb[3].mxu1 }
 0x1ba   : > { %v4854_v39 = vpop.f32.mrb[4].mxu1 }
 0x1bb   : > { %v1557_v40 = vpop.f32.mrb[5].mxu1 }
 0x1be   : > { %v4857_v41 = vpop.f32.mrb[6].mxu1 }
 0x1bf   : > { %v1567_v42 = vpop.f32.mrb[7].mxu1 }
 0x1c2   : > { %v4860_v43 = vpop.f32.mrb[8].mxu1 }
 0x1c3   : > { %v1577_v44 = vpop.f32.mrb[9].mxu1 }
 0x1c6   : > { %v4863_v45 = vpop.f32.mrb[10].mxu1 }
 0x1c7   : > { %v1587_v46 = vpop.f32.mrb[11].mxu1 }
 0x1ca   : > { %v6530_v47 = vpop.f32.mrb[12].mxu1 }
 0x1cb   : > { %v6532_v48 = vpop.f32.mrb[13].mxu1 }
 0x1ce   : > { %v6534_v49 = vpop.f32.mrb[14].mxu1 }
 0x1cf   : > { %v6536_v50 = vpop.f32.mrb[15].mxu1 }
 0x1d2   : > { %v5098_v51 = vpop.f32.mrb[0].mxu0 }
 0x1d3   : > { %v5146_v53 = vadd.f32 %v5098_v51, %v4848_v34  ;;  %v3473_v54 = vpop.f32.mrb[1].mxu0 }
 0x1d4   : > { %v5147_v56 = vadd.f32 %v3473_v54, %v1537_v35 }
 0x1d5   : > { %v3672_v58 = vadd.f32 %v5146_v53, %v6542_v52 }
 0x1d6   : > { %v3671_v59 = vadd.f32 %v5147_v56, %v6542_v52  ;;  %v5101_v60 = vpop.f32.mrb[2].mxu0 }
 0x1d7   : > { %v3704_v62 = vmax.f32 %v3672_v58, 0.0  ;;  %v5148_v63 = vadd.f32 %v5101_v60, %v4851_v36  ;;  %v3483_v0 = vpop.f32.mrb[3].mxu0 }
 0x1d8   : > { %v3703_v2 = vmax.f32 %v3671_v59, 0.0  ;;  %v5149_v4 = vadd.f32 %v3483_v0, %v1547_v38 }
 0x1d9   : > { %3736 = vst [vmem:[%s6548_s9 + $0x8] sm:$0xff] %v3704_v62  ;;  %v3674_v5 = vadd.f32 %v5148_v63, %v6542_v52 }
 0x1da   : > { %3735 = vst [vmem:[%s6548_s9] sm:$0xff] %v3703_v2  ;;  %v3673_v6 = vadd.f32 %v5149_v4, %v6542_v52  ;;  %v5104_v7 = vpop.f32.mrb[4].mxu0 }
 0x1db   : > { %v3706_v9 = vmax.f32 %v3674_v5, 0.0  ;;  %v5150_v10 = vadd.f32 %v5104_v7, %v4854_v39  ;;  %v3493_v55 = vpop.f32.mrb[5].mxu0 }
 0x1dc   : > { %v3705_v57 = vmax.f32 %v3673_v6, 0.0  ;;  %v5151_v28 = vadd.f32 %v3493_v55, %v1557_v40 }
 0x1dd   : > { %3738 = vst [vmem:[%s6548_s9 + $0x18] sm:$0xff] %v3706_v9  ;;  %v3676_v24 = vadd.f32 %v5150_v10, %v6542_v52 }
 0x1de   : > { %3737 = vst [vmem:[%s6548_s9 + $0x10] sm:$0xff] %v3705_v57  ;;  %v3675_v25 = vadd.f32 %v5151_v28, %v6542_v52  ;;  %v5107_v8 = vpop.f32.mrb[6].mxu0 }
 0x1df   : > { %v3708_v11 = vmax.f32 %v3676_v24, 0.0  ;;  %v5152_v13 = vadd.f32 %v5107_v8, %v4857_v41  ;;  %v3503_v15 = vpop.f32.mrb[7].mxu0 }
 0x1e0   : > { %v3707_v17 = vmax.f32 %v3675_v25, 0.0  ;;  %v5153_v19 = vadd.f32 %v3503_v15, %v1567_v42 }
 0x1e1   : > { %3740 = vst [vmem:[%s6548_s9 + $0x28] sm:$0xff] %v3708_v11  ;;  %v3678_v21 = vadd.f32 %v5152_v13, %v6542_v52 }
 0x1e2   : > { %3739 = vst [vmem:[%s6548_s9 + $0x20] sm:$0xff] %v3707_v17  ;;  %v3677_v22 = vadd.f32 %v5153_v19, %v6542_v52  ;;  %v5110_v37 = vpop.f32.mrb[8].mxu0 }
 0x1e3   : > { %v3710_v33 = vmax.f32 %v3678_v21, 0.0  ;;  %v5154_v12 = vadd.f32 %v5110_v37, %v4860_v43  ;;  %v3513_v16 = vpop.f32.mrb[9].mxu0 }
 0x1e4   : > { %v3709_v20 = vmax.f32 %v3677_v22, 0.0  ;;  %v5155_v1 = vadd.f32 %v3513_v16, %v1577_v44 }
 0x1e5   : > { %3742 = vst [vmem:[%s6548_s9 + $0x38] sm:$0xff] %v3710_v33  ;;  %v3680_v3 = vadd.f32 %v5154_v12, %v6542_v52 }
 0x1e6   : > { %3741 = vst [vmem:[%s6548_s9 + $0x30] sm:$0xff] %v3709_v20  ;;  %v3679_v61 = vadd.f32 %v5155_v1, %v6542_v52  ;;  %v5113_v14 = vpop.f32.mrb[10].mxu0 }
 0x1e7   : > { %v3712_v18 = vmax.f32 %v3680_v3, 0.0  ;;  %v5156_v23 = vadd.f32 %v5113_v14, %v4863_v45  ;;  %v3523_v26 = vpop.f32.mrb[11].mxu0 }
 0x1e8   : > { %v3711_v27 = vmax.f32 %v3679_v61, 0.0  ;;  %v5157_v29 = vadd.f32 %v3523_v26, %v1587_v46 }
 0x1e9   : > { %3744 = vst [vmem:[%s6548_s9 + $0x48] sm:$0xff] %v3712_v18  ;;  %v3682_v30 = vadd.f32 %v5156_v23, %v6542_v52 }
 0x1ea   : > { %3743 = vst [vmem:[%s6548_s9 + $0x40] sm:$0xff] %v3711_v27  ;;  %v3681_v31 = vadd.f32 %v5157_v29, %v6542_v52  ;;  %v5116_v32 = vpop.f32.mrb[12].mxu0 }
 0x1eb   : > { %v3714_v34 = vmax.f32 %v3682_v30, 0.0  ;;  %v5158_v35 = vadd.f32 %v5116_v32, %v6530_v47  ;;  %v3533_v36 = vpop.f32.mrb[13].mxu0 }
 0x1ec   : > { %v3713_v38 = vmax.f32 %v3681_v31, 0.0  ;;  %v5159_v39 = vadd.f32 %v3533_v36, %v6532_v48 }
 0x1ed   : > { %3746 = vst [vmem:[%s6548_s9 + $0x58] sm:$0xff] %v3714_v34  ;;  %v3684_v40 = vadd.f32 %v5158_v35, %v6542_v52 }
 0x1ee   : > { %3745 = vst [vmem:[%s6548_s9 + $0x50] sm:$0xff] %v3713_v38  ;;  %v3683_v41 = vadd.f32 %v5159_v39, %v6542_v52  ;;  %v5119_v42 = vpop.f32.mrb[14].mxu0 }
 0x1ef   : > { %v3716_v43 = vmax.f32 %v3684_v40, 0.0  ;;  %v5160_v44 = vadd.f32 %v5119_v42, %v6534_v49  ;;  %v3543_v45 = vpop.f32.mrb[15].mxu0 }
 0x1f0   : > { %v3715_v46 = vmax.f32 %v3683_v41, 0.0  ;;  %v5161_v47 = vadd.f32 %v3543_v45, %v6536_v50 }
 0x1f1   : > { %3748 = vst [vmem:[%s6548_s9 + $0x68] sm:$0xff] %v3716_v43  ;;  %v3686_v51 = vadd.f32 %v5160_v44, %v6542_v52 }
 0x1f2   : > { %3747 = vst [vmem:[%s6548_s9 + $0x60] sm:$0xff] %v3715_v46  ;;  %v3685_v48 = vadd.f32 %v5161_v47, %v6542_v52  ;;  %v4922_v53 = vpop.f32.mrb[16].mxu1  ;;  %v5122_v54 = vpop.f32.mrb[16].mxu0 }
 0x1f3   : > { %v3718_v56 = vmax.f32 %v3686_v51, 0.0  ;;  %v5162_v58 = vadd.f32 %v5122_v54, %v4922_v53  ;;  %v2004_v59 = vpop.f32.mrb[17].mxu1  ;;  %v3553_v60 = vpop.f32.mrb[17].mxu0 }
 0x1f4   : > { %v3717_v49 = vmax.f32 %v3685_v48, 0.0  ;;  %v5163_v62 = vadd.f32 %v3553_v60, %v2004_v59 }
 0x1f5   : > { %3750 = vst [vmem:[%s6548_s9 + $0x78] sm:$0xff] %v3718_v56  ;;  %v3688_v63 = vadd.f32 %v5162_v58, %v6542_v52 }
 0x1f6   : > { %3749 = vst [vmem:[%s6548_s9 + $0x70] sm:$0xff] %v3717_v49  ;;  %v3687_v50 = vadd.f32 %v5163_v62, %v6542_v52  ;;  %v4925_v0 = vpop.f32.mrb[18].mxu1  ;;  %v5125_v2 = vpop.f32.mrb[18].mxu0 }
 0x1f7   : > { %v3720_v4 = vmax.f32 %v3688_v63, 0.0  ;;  %v5164_v5 = vadd.f32 %v5125_v2, %v4925_v0  ;;  %v2014_v6 = vpop.f32.mrb[19].mxu1  ;;  %v3563_v7 = vpop.f32.mrb[19].mxu0 }
 0x1f8   : > { %v3719_v9 = vmax.f32 %v3687_v50, 0.0  ;;  %v5165_v10 = vadd.f32 %v3563_v7, %v2014_v6 }
 0x1f9   : > { %3752 = vst [vmem:[%s6548_s9 + $0x88] sm:$0xff] %v3720_v4  ;;  %v3690_v55 = vadd.f32 %v5164_v5, %v6542_v52 }
 0x1fa   : > { %3751 = vst [vmem:[%s6548_s9 + $0x80] sm:$0xff] %v3719_v9  ;;  %v3689_v57 = vadd.f32 %v5165_v10, %v6542_v52  ;;  %v4928_v28 = vpop.f32.mrb[20].mxu1  ;;  %v5128_v24 = vpop.f32.mrb[20].mxu0 }
 0x1fb   : > { %v3722_v25 = vmax.f32 %v3690_v55, 0.0  ;;  %v5166_v8 = vadd.f32 %v5128_v24, %v4928_v28  ;;  %v2024_v11 = vpop.f32.mrb[21].mxu1  ;;  %v3573_v13 = vpop.f32.mrb[21].mxu0 }
 0x1fc   : > { %v3721_v15 = vmax.f32 %v3689_v57, 0.0  ;;  %v5167_v17 = vadd.f32 %v3573_v13, %v2024_v11 }
 0x1fd   : > { %3754 = vst [vmem:[%s6548_s9 + $0x98] sm:$0xff] %v3722_v25  ;;  %v3692_v19 = vadd.f32 %v5166_v8, %v6542_v52 }
 0x1fe   : > { %3753 = vst [vmem:[%s6548_s9 + $0x90] sm:$0xff] %v3721_v15  ;;  %v3691_v21 = vadd.f32 %v5167_v17, %v6542_v52  ;;  %v4931_v22 = vpop.f32.mrb[22].mxu1  ;;  %v5131_v37 = vpop.f32.mrb[22].mxu0 }
 0x1ff   : > { %v3724_v33 = vmax.f32 %v3692_v19, 0.0  ;;  %v5168_v12 = vadd.f32 %v5131_v37, %v4931_v22  ;;  %v2034_v16 = vpop.f32.mrb[23].mxu1  ;;  %v3583_v20 = vpop.f32.mrb[23].mxu0 }
 0x200   : > { %v3723_v1 = vmax.f32 %v3691_v21, 0.0  ;;  %v5169_v3 = vadd.f32 %v3583_v20, %v2034_v16 }
 0x201   : > { %3756 = vst [vmem:[%s6548_s9 + $0xa8] sm:$0xff] %v3724_v33  ;;  %v3694_v61 = vadd.f32 %v5168_v12, %v6542_v52 }
 0x202   : > { %3755 = vst [vmem:[%s6548_s9 + $0xa0] sm:$0xff] %v3723_v1  ;;  %v3693_v14 = vadd.f32 %v5169_v3, %v6542_v52  ;;  %v4934_v18 = vpop.f32.mrb[24].mxu1  ;;  %v5134_v23 = vpop.f32.mrb[24].mxu0 }
 0x203   : > { %v3726_v26 = vmax.f32 %v3694_v61, 0.0  ;;  %v5170_v27 = vadd.f32 %v5134_v23, %v4934_v18  ;;  %v2044_v29 = vpop.f32.mrb[25].mxu1  ;;  %v3593_v30 = vpop.f32.mrb[25].mxu0 }
 0x204   : > { %v3725_v31 = vmax.f32 %v3693_v14, 0.0  ;;  %v5171_v32 = vadd.f32 %v3593_v30, %v2044_v29 }
 0x205   : > { %3758 = vst [vmem:[%s6548_s9 + $0xb8] sm:$0xff] %v3726_v26  ;;  %v3696_v34 = vadd.f32 %v5170_v27, %v6542_v52 }
 0x206   : > { %3757 = vst [vmem:[%s6548_s9 + $0xb0] sm:$0xff] %v3725_v31  ;;  %v3695_v35 = vadd.f32 %v5171_v32, %v6542_v52  ;;  %v4937_v36 = vpop.f32.mrb[26].mxu1  ;;  %v5137_v38 = vpop.f32.mrb[26].mxu0 }
 0x207   : > { %v3728_v39 = vmax.f32 %v3696_v34, 0.0  ;;  %v5172_v40 = vadd.f32 %v5137_v38, %v4937_v36  ;;  %v2054_v41 = vpop.f32.mrb[27].mxu1  ;;  %v3603_v42 = vpop.f32.mrb[27].mxu0 }
 0x208   : > { %v3727_v43 = vmax.f32 %v3695_v35, 0.0  ;;  %v5173_v44 = vadd.f32 %v3603_v42, %v2054_v41 }
 0x209   : > { %3760 = vst [vmem:[%s6548_s9 + $0xc8] sm:$0xff] %v3728_v39  ;;  %v3698_v45 = vadd.f32 %v5172_v40, %v6542_v52 }
 0x20a   : > { %3759 = vst [vmem:[%s6548_s9 + $0xc0] sm:$0xff] %v3727_v43  ;;  %v3697_v46 = vadd.f32 %v5173_v44, %v6542_v52  ;;  %v4940_v47 = vpop.f32.mrb[28].mxu1  ;;  %v5140_v51 = vpop.f32.mrb[28].mxu0 }
 0x20b   : > { %v3730_v48 = vmax.f32 %v3698_v45, 0.0  ;;  %v5174_v53 = vadd.f32 %v5140_v51, %v4940_v47  ;;  %v2064_v54 = vpop.f32.mrb[29].mxu1  ;;  %v3613_v56 = vpop.f32.mrb[29].mxu0 }
 0x20c   : > { %v3729_v58 = vmax.f32 %v3697_v46, 0.0  ;;  %v5175_v59 = vadd.f32 %v3613_v56, %v2064_v54 }
 0x20d   : > { %3762 = vst [vmem:[%s6548_s9 + $0xd8] sm:$0xff] %v3730_v48  ;;  %v3700_v60 = vadd.f32 %v5174_v53, %v6542_v52 }
 0x20e   : > { %3761 = vst [vmem:[%s6548_s9 + $0xd0] sm:$0xff] %v3729_v58  ;;  %v3699_v49 = vadd.f32 %v5175_v59, %v6542_v52  ;;  %v4943_v62 = vpop.f32.mrb[30].mxu1  ;;  %v5143_v63 = vpop.f32.mrb[30].mxu0 }
 0x20f   : > { %v3732_v50 = vmax.f32 %v3700_v60, 0.0  ;;  %v5176_v0 = vadd.f32 %v5143_v63, %v4943_v62  ;;  %v2074_v2 = vpop.f32.mrb[31].mxu1  ;;  %v3623_v4 = vpop.f32.mrb[31].mxu0 }
 0x210   : > { %v3731_v5 = vmax.f32 %v3699_v49, 0.0  ;;  %v5177_v6 = vadd.f32 %v3623_v4, %v2074_v2 }
 0x211   : > { %3764 = vst [vmem:[%s6548_s9 + $0xe8] sm:$0xff] %v3732_v50  ;;  %v3702_v7 = vadd.f32 %v5176_v0, %v6542_v52 }
 0x212   : > { %3763 = vst [vmem:[%s6548_s9 + $0xe0] sm:$0xff] %v3731_v5  ;;  %v3701_v9 = vadd.f32 %v5177_v6, %v6542_v52 }
 0x213   : > { %v3734_v10 = vmax.f32 %v3702_v7, 0.0 }
 0x214   : > { %v3733_v55 = vmax.f32 %v3701_v9, 0.0 }
 0x215   : > { %3766 = vst [vmem:[%s6548_s9 + $0xf8] sm:$0xff] %v3734_v10 }
 0x216   : > { %3765 = vst [vmem:[%s6548_s9 + $0xf0] sm:$0xff] %v3733_v55 }
 0x217   : > { %5473 = shalt.err (!%p5470_p5)
}
 0x218   : > { %s5474_s29 = scalar_lea.hbm %s6619_s21, 4096  ;;  %s5478_s5 = scalar_lea.hbm %s6676_s3, 8192 }
 0x219   : > { %p5475_p6 = scmp.ne.s32.totalorder %s6619_s21, %s5474_s29  ;;  %p5479_p10 = scmp.lt.u32.totalorder %s6619_s21, %s6676_s3 }
 0x21a   : > { %p5480_p11 = scmp.lt.u32.totalorder %s5478_s5, %s5474_s29  ;;  %p5482_p13 = scmp.lt.u32.totalorder %s5474_s29, %s6619_s21 }
 0x21b   : > { %p5476_p7 = pnand %p5475_p6, %p5603_p4 }
 0x21c   : > { %p5481_p12 = por %p5480_p11, %p5479_p10 }
 0x21d   : > { %p5477_p9 = pneg %p5476_p7 }
 0x21e   : > { %p5483_p0 = por %p5482_p13, %p5481_p12 }
 0x220   : > { %p5484_p1 = pnand %p5483_p0, %p5477_p9 }
 0x222   : > { %5487 = shalt.err (!%p5484_p1)
}
 0x223   : > { %s5541_s8 = smov 128   ;;  %s5542_s9 = smov 8  }
 0x224   : > { %5403 = dma.vmem_to_hbm [thread:$0]  (%p5603_p4), %s6621_s11, 4096, %s6619_s21, %s6627_s15, %s5541_s8, %s5541_s8, %s5542_s9  }
 0x225 PF: > { %p5409_p2 = scmp.ge.s32.totalorder %s5538_s17, 2  ;;  %s3797_s10 = sand.u32 1, %s5518_s12  }
 0x226   : > { %s3798_s18 = scalar_lea.sflag [#allocation3], %s3797_s10 }
 0x227   : > { %p5406_p3 = pnand %p5409_p2, %p5610_p8 }
 0x229   : > { %5513 = dma.done.wait (!%p5406_p3), %s3798_s18, 4096  }
 0x22a   : > { %5515 = vsyncadd (!%p5406_p3), %s3798_s18, 4294963200  ;;  %s16_s17 = sadd.s32 1, %s5538_s17   ;;  %s6788_s12 = smov %s5522_s13 }
 0x22b   : > { %p13_p5 = scmp.ge.s32.totalorder %s16_s17, 4   ;;  %s6789_s13 = smov %s5526_s14 }
 0x22c   : > { %s6790_s14 = smov %s5616_s25  ;;  %s6791_s15 = smov %s5534_s16 }
 0x22d   : > { %s6792_s16 = smov %s6794_s20  ;;  %15 = sbr.rel (!%p13_p5) target bundleno = 4 (0x4), region = 83 }
 0x234   :  { %3803 = vsyncpa [#allocation3], 1 }
 0x235   :  { %3805 = vsyncpa [#allocation3 + $0x1], 1 }

</bundles_post_ra>
